<compile_context>
chip_gen: v7x
topology: tpu7x:2x2x1
jax: 0.10.0
libtpu: 0.0.40
codegen_flags: <defaults>
</compile_context>

<pallas_src>
import jax
import jax.numpy as jnp
import numpy as np
from jax import lax
from jax.experimental import pallas as pl
from jax.experimental.pallas import tpu as pltpu


def self_attn_kernel(x_ref, wqk_ref, ckey_ref, wv_ref, bv_ref, gamma_ref, o_ref):
    # x_ref block: (block_b, C, N) f32, channel-major, N = H*W lane-dense.
    gamma = gamma_ref[0, 0]                         # SMEM scalar
    wqk = wqk_ref[...]                              # (C, C)  bf16, Wq^T @ Wk
    ckey = ckey_ref[...]                            # (1, C)  bf16, bq @ Wk
    wv = wv_ref[...]                                # (C, C)  bf16
    bv = bv_ref[...]                                # (C, 1)  f32

    block_b, _, n = x_ref.shape
    # Hoisted constants (JAX does not CSE broadcasts inside the loop).
    ones_row = jnp.ones((1, n), dtype=jnp.bfloat16)

    for bb in range(block_b):                       # static, unrolled
        x = x_ref[bb]                               # (C, N) f32
        x_bf = x.astype(jnp.bfloat16)

        # m[d, i] = sum_c W_qk[c, d] * x[c, i]                       -> (C, N)
        m = lax.dot_general(wqk, x_bf, (((0,), (0,)), ((), ())),
                            preferred_element_type=jnp.float32)
        # s[i, j] = sum_d m[d, i] * x[d, j]                          -> (N, N)
        s = lax.dot_general(m.astype(jnp.bfloat16), x_bf,
                            (((0,), (0,)), ((), ())),
                            preferred_element_type=jnp.float32)
        # key-side bias kb[j] = sum_d (bq @ Wk)[d] * x[d, j]         -> (1, N)
        kb = lax.dot_general(ckey, x_bf, (((1,), (0,)), ((), ())),
                             preferred_element_type=jnp.float32)
        s = s + kb                                  # broadcast over query rows

        # Stable softmax numerator over keys (last axis); math in f32.
        s = s - jnp.max(s, axis=-1, keepdims=True)
        p_bf = jnp.exp(s).astype(jnp.bfloat16)      # unnormalized probs (N, N)

        # Row sums produced directly in lane layout on the MXU (it has slack):
        # denom[0, i] = sum_j p[i, j]                                -> (1, N)
        denom = lax.dot_general(ones_row, p_bf, (((1,), (1,)), ((), ())),
                                preferred_element_type=jnp.float32)
        # gamma / denom fused; EUP reciprocal is off the VPU critical path.
        scale = gamma * pl.reciprocal(denom, approx=True)            # (1, N)

        # Value projection v[c, j] = sum_d Wv[c, d] x[d, j] + bv[c]  -> (C, N)
        v = lax.dot_general(wv, x_bf, (((1,), (0,)), ((), ())),
                            preferred_element_type=jnp.float32) + bv

        # out[c, i] = sum_j v[c, j] * p[i, j]                        -> (C, N)
        out = lax.dot_general(v.astype(jnp.bfloat16), p_bf,
                              (((1,), (1,)), ((), ())),
                              preferred_element_type=jnp.float32)

        # Deferred normalization + gamma + residual, all f32 on (C, N).
        o_ref[bb] = out * scale + x


def self_attention(x_nchw, wq, bq, wk, bk, wv, bv, gamma, *, block_b=None):
    """x_nchw: (B, C, H, W); wq/wk: (C//8, C, 1, 1); wv: (C, C, 1, 1); gamma: (1,)."""
    B, C, H, W = x_nchw.shape
    N = H * W

    # Channel-major layout: pure reshape, no HBM transpose passes.
    x_seq = x_nchw.reshape(B, C, N).astype(jnp.float32)

    wq2 = wq[:, :, 0, 0].astype(jnp.float32)        # (C8, C)
    wk2 = wk[:, :, 0, 0].astype(jnp.float32)        # (C8, C)
    wv2 = wv[:, :, 0, 0].astype(jnp.float32)        # (C, C)

    # Fold query/key projections.  Softmax over keys is invariant to per-row
    # (query-only) shifts, so only W_qk = Wq^T Wk and the key-side bias
    # bq @ Wk survive; bk and the bq.bk constant cancel exactly.
    wqk = (wq2.T @ wk2).astype(jnp.bfloat16)                     # (C, C)
    ckey = (bq.astype(jnp.float32) @ wk2).reshape(1, C).astype(jnp.bfloat16)
    wv_bf = wv2.astype(jnp.bfloat16)                             # (C, C)
    bv2 = bv.reshape(C, 1).astype(jnp.float32)                   # (C, 1)
    gamma2 = gamma.reshape(1, 1).astype(jnp.float32)             # SMEM scalar

    if block_b is None:
        # Amortize per-grid-step overhead, but keep >= 2 grid steps so the
        # batch axis can still be split across v7x TensorCores.
        block_b = 1
        for cand in (8, 4, 2):
            if B % cand == 0 and B // cand >= 2:
                block_b = cand
                break
    assert B % block_b == 0
    grid = (B // block_b,)

    # Raise the scoped VMEM limit only when the un-tiled (N, N) softmax would
    # exceed the 32 MiB default (moderate N); larger N needs the tiled path.
    score_bytes = 4 * N * N
    io_bytes = 2 * 2 * (4 * block_b * C * N)        # double-buffered x & out
    vmem_needed = 3 * score_bytes + io_bytes + (2 << 20)
    compiler_kwargs = dict(dimension_semantics=("parallel",))
    if vmem_needed > (32 << 20):
        compiler_kwargs["vmem_limit_bytes"] = int(min(vmem_needed, 100 << 20))

    out_seq = pl.pallas_call(
        self_attn_kernel,
        out_shape=jax.ShapeDtypeStruct((B, C, N), jnp.float32),
        grid_spec=pltpu.PrefetchScalarGridSpec(
            num_scalar_prefetch=0,
            grid=grid,
            in_specs=[
                pl.BlockSpec((block_b, C, N), lambda b: (b, 0, 0)),   # x
                pl.BlockSpec((C, C), lambda b: (0, 0)),               # W_qk
                pl.BlockSpec((1, C), lambda b: (0, 0)),               # bq @ Wk
                pl.BlockSpec((C, C), lambda b: (0, 0)),               # Wv
                pl.BlockSpec((C, 1), lambda b: (0, 0)),               # bv
                pl.BlockSpec(memory_space=pltpu.SMEM),                # gamma
            ],
            out_specs=pl.BlockSpec((block_b, C, N), lambda b: (b, 0, 0)),
        ),
        compiler_params=pltpu.CompilerParams(**compiler_kwargs),
    )(x_seq, wqk, ckey, wv_bf, bv2, gamma2)

    # Channel-major output: pure reshape back to NCHW.
    return out_seq.reshape(B, C, H, W)


def reference(x, wq, bq, wk, bk, wv, bv, gamma):
    """Pure-JAX (f32) replica of the PyTorch forward for correctness checking."""
    B, C, H, W = x.shape
    N = H * W
    xf = x.reshape(B, C, N)
    q = jnp.einsum('oc,bcn->bon', wq[:, :, 0, 0], xf) + bq[None, :, None]
    k = jnp.einsum('oc,bcn->bon', wk[:, :, 0, 0], xf) + bk[None, :, None]
    v = jnp.einsum('oc,bcn->bon', wv[:, :, 0, 0], xf) + bv[None, :, None]
    s = jnp.einsum('bdi,bdj->bij', q, k)                             # (B, N, N)
    a = jax.nn.softmax(s, axis=-1)
    out = jnp.einsum('bcj,bij->bci', v, a).reshape(B, C, H, W)
    return gamma[0] * out + x


if __name__ == "__main__":
    B, C, H, W = 2, 32, 16, 16       # in_channels=32 -> C//8 = 4
    C8 = C // 8

    key = jax.random.PRNGKey(0)
    kx, kwq, kbq, kwk, kbk, kwv, kbv = jax.random.split(key, 7)

    x = jax.random.normal(kx, (B, C, H, W), dtype=jnp.float32)
    # Conv2d(kernel_size=1) parameter shapes per the module __init__.
    wq = jax.random.normal(kwq, (C8, C, 1, 1), dtype=jnp.float32) * 0.1
    bq = jax.random.normal(kbq, (C8,), dtype=jnp.float32) * 0.1
    wk = jax.random.normal(kwk, (C8, C, 1, 1), dtype=jnp.float32) * 0.1
    bk = jax.random.normal(kbk, (C8,), dtype=jnp.float32) * 0.1
    wv = jax.random.normal(kwv, (C, C, 1, 1), dtype=jnp.float32) * 0.1
    bv = jax.random.normal(kbv, (C,), dtype=jnp.float32) * 0.1
    # PyTorch inits gamma to 0 (output == x); nonzero here so the attention
    # path is actually exercised by the check.
    gamma = jnp.array([0.5], dtype=jnp.float32)

    y = self_attention(x, wq, bq, wk, bk, wv, bv, gamma)
    jax.block_until_ready(y)

    y_ref = reference(x, wq, bq, wk, bk, wv, bv, gamma)
    # bf16 MXU operands + approx reciprocal vs. full-f32 reference.
    np.testing.assert_allclose(np.asarray(y), np.asarray(y_ref),
                               rtol=5e-2, atol=5e-2)
    print("KERNEL_OK")
</pallas_src>

<mosaic_0001>
module attributes {stable_mosaic.version = 11 : i64} {
  func.func @self_attn_kernel(%arg0: i32, %arg1: memref<1x32x256xf32, #tpu.memory_space<vmem>>, %arg2: memref<32x32xbf16, #tpu.memory_space<vmem>>, %arg3: memref<1x32xbf16, #tpu.memory_space<vmem>>, %arg4: memref<32x32xbf16, #tpu.memory_space<vmem>>, %arg5: memref<32x1xf32, #tpu.memory_space<vmem>>, %arg6: memref<1x1xf32, #tpu.memory_space<smem>>, %arg7: memref<1x32x256xf32, #tpu.memory_space<vmem>>) attributes {dimension_semantics = [#tpu.dimension_semantics<parallel>], iteration_bounds = array<i64: 2>, scalar_prefetch = 0 : i64, scratch_operands = 0 : i64, tpu.core_type = #tpu.core_type<tc>, window_params = [{transform_indices = @transform_0, window_bounds = array<i64: 1, 32, 256>}, {pipeline_mode = #tpu.pipeline_mode<synchronous>, transform_indices = @transform_1, window_bounds = array<i64: 32, 32>}, {pipeline_mode = #tpu.pipeline_mode<synchronous>, transform_indices = @transform_2, window_bounds = array<i64: 1, 32>}, {pipeline_mode = #tpu.pipeline_mode<synchronous>, transform_indices = @transform_3, window_bounds = array<i64: 32, 32>}, {pipeline_mode = #tpu.pipeline_mode<synchronous>, transform_indices = @transform_4, window_bounds = array<i64: 32, 1>}, {transform_indices = @transform_5, window_bounds = array<i64: 1, 1>}, {transform_indices = @transform_6, window_bounds = array<i64: 1, 32, 256>}]} {
    %c0 = arith.constant 0 : index
    %c0_0 = arith.constant 0 : index
    %0 = memref.load %arg6[%c0, %c0_0] : memref<1x1xf32, #tpu.memory_space<smem>>
    %c0_1 = arith.constant 0 : index
    %c0_2 = arith.constant 0 : index
    %1 = vector.load %arg2[%c0_1, %c0_2] : memref<32x32xbf16, #tpu.memory_space<vmem>>, vector<32x32xbf16>
    %c0_3 = arith.constant 0 : index
    %c0_4 = arith.constant 0 : index
    %2 = vector.load %arg3[%c0_3, %c0_4] : memref<1x32xbf16, #tpu.memory_space<vmem>>, vector<1x32xbf16>
    %c0_5 = arith.constant 0 : index
    %c0_6 = arith.constant 0 : index
    %3 = vector.load %arg4[%c0_5, %c0_6] : memref<32x32xbf16, #tpu.memory_space<vmem>>, vector<32x32xbf16>
    %c0_7 = arith.constant 0 : index
    %c0_8 = arith.constant 0 : index
    %4 = vector.load %arg5[%c0_7, %c0_8] : memref<32x1xf32, #tpu.memory_space<vmem>>, vector<32x1xf32>
    %cst = arith.constant 1.000000e+00 : bf16
    %5 = vector.broadcast %cst : bf16 to vector<1x256xbf16>
    %c0_9 = arith.constant 0 : index
    %c0_10 = arith.constant 0 : index
    %c0_11 = arith.constant 0 : index
    %6 = vector.load %arg1[%c0_9, %c0_10, %c0_11] : memref<1x32x256xf32, #tpu.memory_space<vmem>>, vector<1x32x256xf32>
    %7 = vector.shape_cast %6 : vector<1x32x256xf32> to vector<32x256xf32>
    %8 = arith.truncf %7 : vector<32x256xf32> to vector<32x256xbf16>
    %cst_12 = arith.constant dense<0.000000e+00> : vector<32x256xf32>
    %9 = tpu.matmul %1, %8, %cst_12 {dimension_numbers = #tpu.dot_dimension_numbers<[0], [0], [1], [1], [0, 1, 1, 1], [], []>} : vector<32x32xbf16>, vector<32x256xbf16>, vector<32x256xf32> -> vector<32x256xf32>
    %10 = arith.truncf %9 : vector<32x256xf32> to vector<32x256xbf16>
    %cst_13 = arith.constant dense<0.000000e+00> : vector<256x256xf32>
    %11 = tpu.matmul %10, %8, %cst_13 {dimension_numbers = #tpu.dot_dimension_numbers<[0], [0], [1], [1], [0, 1, 1, 1], [], []>} : vector<32x256xbf16>, vector<32x256xbf16>, vector<256x256xf32> -> vector<256x256xf32>
    %cst_14 = arith.constant dense<0.000000e+00> : vector<1x256xf32>
    %12 = tpu.matmul %2, %8, %cst_14 {dimension_numbers = #tpu.dot_dimension_numbers<[1], [0], [0], [1], [0, 0, 1, 1], [], []>} : vector<1x32xbf16>, vector<32x256xbf16>, vector<1x256xf32> -> vector<1x256xf32>
    %13 = vector.broadcast %12 : vector<1x256xf32> to vector<256x256xf32>
    %14 = arith.addf %11, %13 : vector<256x256xf32>
    %cst_15 = arith.constant dense<0xFF800000> : vector<256xf32>
    %15 = vector.multi_reduction <maximumf>, %14, %cst_15 [1] : vector<256x256xf32> to vector<256xf32>
    %16 = vector.shape_cast %15 : vector<256xf32> to vector<256x1xf32>
    %17 = vector.broadcast %16 : vector<256x1xf32> to vector<256x256xf32>
    %18 = arith.subf %14, %17 : vector<256x256xf32>
    %19 = math.exp %18 : vector<256x256xf32>
    %20 = arith.truncf %19 : vector<256x256xf32> to vector<256x256xbf16>
    %cst_16 = arith.constant dense<0.000000e+00> : vector<1x256xf32>
    %21 = tpu.matmul %5, %20, %cst_16 {dimension_numbers = #tpu.dot_dimension_numbers<[1], [1], [0], [0], [0, 0, 1, 0], [], []>} : vector<1x256xbf16>, vector<256x256xbf16>, vector<1x256xf32> -> vector<1x256xf32>
    %22 = tpu.reciprocal %21 {approx = true} : vector<1x256xf32> -> vector<1x256xf32>
    %23 = vector.broadcast %0 : f32 to vector<1x256xf32>
    %24 = arith.mulf %23, %22 : vector<1x256xf32>
    %cst_17 = arith.constant dense<0.000000e+00> : vector<32x256xf32>
    %25 = tpu.matmul %3, %8, %cst_17 {dimension_numbers = #tpu.dot_dimension_numbers<[1], [0], [0], [1], [0, 0, 1, 1], [], []>} : vector<32x32xbf16>, vector<32x256xbf16>, vector<32x256xf32> -> vector<32x256xf32>
    %26 = vector.broadcast %4 : vector<32x1xf32> to vector<32x256xf32>
    %27 = arith.addf %25, %26 : vector<32x256xf32>
    %28 = arith.truncf %27 : vector<32x256xf32> to vector<32x256xbf16>
    %cst_18 = arith.constant dense<0.000000e+00> : vector<32x256xf32>
    %29 = tpu.matmul %28, %20, %cst_18 {dimension_numbers = #tpu.dot_dimension_numbers<[1], [1], [0], [0], [0, 0, 1, 0], [], []>} : vector<32x256xbf16>, vector<256x256xbf16>, vector<32x256xf32> -> vector<32x256xf32>
    %30 = vector.broadcast %24 : vector<1x256xf32> to vector<32x256xf32>
    %31 = arith.mulf %29, %30 : vector<32x256xf32>
    %32 = arith.addf %31, %7 : vector<32x256xf32>
    %c0_19 = arith.constant 0 : index
    %c0_20 = arith.constant 0 : index
    %c0_21 = arith.constant 0 : index
    %33 = vector.load %arg7[%c0_19, %c0_20, %c0_21] : memref<1x32x256xf32, #tpu.memory_space<vmem>>, vector<1x32x256xf32>
    %34 = vector.shape_cast %33 : vector<1x32x256xf32> to vector<32x256xf32>
    %35 = vector.shape_cast %32 : vector<32x256xf32> to vector<1x32x256xf32>
    tpu.vector_store %arg7[%c0_19, %c0_20, %c0_21], %35 {strides = array<i32>} : memref<1x32x256xf32, #tpu.memory_space<vmem>>, vector<1x32x256xf32>,
    return
  }
  func.func @transform_0(%arg0: i32) -> (i32, i32, i32) {
    %c0_i32 = arith.constant 0 : i32
    %c0_i32_0 = arith.constant 0 : i32
    %c0_i32_1 = arith.constant 0 : i32
    return %arg0, %c0_i32, %c0_i32_0 : i32, i32, i32
  }
  func.func @transform_1(%arg0: i32) -> (i32, i32) {
    %c0_i32 = arith.constant 0 : i32
    %c0_i32_0 = arith.constant 0 : i32
    %c0_i32_1 = arith.constant 0 : i32
    return %c0_i32, %c0_i32_0 : i32, i32
  }
  func.func @transform_2(%arg0: i32) -> (i32, i32) {
    %c0_i32 = arith.constant 0 : i32
    %c0_i32_0 = arith.constant 0 : i32
    %c0_i32_1 = arith.constant 0 : i32
    return %c0_i32, %c0_i32_0 : i32, i32
  }
  func.func @transform_3(%arg0: i32) -> (i32, i32) {
    %c0_i32 = arith.constant 0 : i32
    %c0_i32_0 = arith.constant 0 : i32
    %c0_i32_1 = arith.constant 0 : i32
    return %c0_i32, %c0_i32_0 : i32, i32
  }
  func.func @transform_4(%arg0: i32) -> (i32, i32) {
    %c0_i32 = arith.constant 0 : i32
    %c0_i32_0 = arith.constant 0 : i32
    %c0_i32_1 = arith.constant 0 : i32
    return %c0_i32, %c0_i32_0 : i32, i32
  }
  func.func @transform_5(%arg0: i32) -> (i32, i32) {
    %c0_i32 = arith.constant 0 : i32
    %c0_i32_0 = arith.constant 0 : i32
    %c0_i32_1 = arith.constant 0 : i32
    return %c0_i32, %c0_i32_0 : i32, i32
  }
  func.func @transform_6(%arg0: i32) -> (i32, i32, i32) {
    %c0_i32 = arith.constant 0 : i32
    %c0_i32_0 = arith.constant 0 : i32
    %c0_i32_1 = arith.constant 0 : i32
    return %arg0, %c0_i32, %c0_i32_0 : i32, i32, i32
  }
}

</mosaic_0001>

<bundles_post_ra>
// kernel: tpu_custom_call.1
= control target key start
LH: loop header
LB: loop body
LE: loop exit
PB: predicated region body
PF: predicated region fallthrough
CT: control target
= control target key end

     0   :  { %s2352_s0 = inlined_call_operand.hbm [shape: f32[2,32,256], index: 0, kind: input, shape index: {}]   ;;  %s2353_s1 = inlined_call_operand.vmem [shape: bf16[32,32], index: 1, kind: input, shape index: {}]   ;;  %s2354_s2 = inlined_call_operand.vmem [shape: bf16[1,32], index: 2, kind: input, shape index: {}]   ;;  %s2355_s3 = inlined_call_operand.vmem [shape: bf16[32,32], index: 3, kind: input, shape index: {}]   ;;  %s2356_s4 = inlined_call_operand.vmem [shape: f32[32,1], index: 4, kind: input, shape index: {}]   ;;  %s2357_s5 = inlined_call_operand.<no memory space> [shape: f32[1,1], index: 5, kind: input, shape index: {}]   ;;  %s2358_s6 = inlined_call_operand.hbm [shape: f32[2,32,256], index: 6, kind: output, shape index: {}]  }
   0x1   :  { %11 = sst [smem:[#allocation2]] %s2357_s5 }
   0x2   :  { %12 = vsyncpa [#allocation4], 0 }
   0x3   :  { %14 = vsyncpa [#allocation4 + $0x1], 0 }
   0x4   :  { %15 = vsyncpa [#allocation5], 0 }
   0x5   :  { %17 = vsyncpa [#allocation5 + $0x1], 0  ;;  %s1730_s23 = smov 0   ;;  %s1732_s24 = smov 0  }
   0x6   :  { %s1734_s25 = smov 0   ;;  %s1736_s26 = smov 0  }
   0x7 LB: > { %s1751_s5 = sadd.s32 4294967295, %s1682_s26   ;;  %s1347_s27 = sadd.s32 4294967294, %s1682_s26   ;;  %s1682_s26 = sphi %s1736_s26, %s2429_s26   ;;  %s1678_s25 = sphi %s1734_s25, %s2428_s25   ;;  %s1674_s24 = sphi %s1732_s24, %s2427_s24   ;;  %s1670_s23 = sphi %s1730_s23, %s2426_s23  }
   0x8   : > { %s1755_s28 = sadd.s32 1, %s1682_s26   ;;  %s30_s29 = sadd.s32 1, %s1678_s25 }
   0x9   : > { %s27_s30 = ssub.s32 %s1682_s26, %s1755_s28  ;;  %p37_p0 = scmp.ne.s32.totalorder %s1678_s25, %s1674_s24 }
   0xa   : > { %p28_p1 = scmp.eq.s32.totalorder %s27_s30, 0  ;;  %p38_p2 = scmp.eq.s32.totalorder %s1682_s26, 0 }
   0xb   : > { %p43_p3 = scmp.ne.s32.totalorder %s1674_s24, %s1670_s23  ;;  %p44_p4 = scmp.eq.s32.totalorder %s1751_s5, 0 }
   0xc   : > { %s1767_s7 = scalar_select %p28_p1, %s1678_s25, %s30_s29  }
   0xd   : > { %p1769_p5 = por %p38_p2, %p37_p0  ;;  %p1773_p6 = por %p44_p4, %p43_p3 }
   0xe   : > { %p172_p7 = scmp.eq.s32.totalorder %s1751_s5, 1  ;;  %p178_p8 = scmp.eq.s32.totalorder %s1347_s27, 1 }
   0xf   : > { %p1400_p10 = scmp.lt.s32.totalorder %s1682_s26, 2  ;;  %s213_s12 = sand.u32 1, %s1678_s25  }
  0x10   : > { %p1780_p11 = por %p172_p7, %p37_p0  ;;  %p1784_p12 = por %p178_p8, %p43_p3 }
  0x11   : > { %s1386_s13 = sshll.u32 %s1682_s26, 10  ;;  %s1350_s14 = sshll.u32 %s213_s12, 6 }
  0x12   : > { %s2383_s10 = scalar_select %p1780_p11, 1, 0 }
  0x13   : > { %s2384_s11 = scalar_select %p1784_p12, 1, 0 }
  0x14   : > { %s1793_s17 = scalar_lea.hbm %s2352_s0, %s1386_s13  ;;  %s217_s18 = scalar_lea.vmem [#allocation3], %s1350_s14 }
  0x15   : > { %s224_s19 = sshll.u32 %s217_s18, 4  ;;  %p1797_p13 = pnand %p1400_p10, %p1769_p5  ;;  %s1801_s19 = int_to_ptr.vmem [resolvable:$true] %s224_s19 }
  0x16   : > { %s1803_s21 = scalar_lea.sflag [#allocation4], %s213_s12  ;;  %s1586_s22 = scalar_lea.hbm %s1793_s17, 1024 }
  0x17   : > { %p1587_p0 = scmp.ne.s32.totalorder %s1793_s17, %s1586_s22  ;;  %p1588_p1 = pneg %p1797_p13 }
  0x18   : > { %s1591_s30 = scalar_lea.hbm %s2352_s0, 2048  ;;  %p1592_p4 = scmp.lt.u32.totalorder %s1793_s17, %s2352_s0 }
  0x19   : > { %p1589_p2 = pnand %p1588_p1, %p1587_p0  ;;  %p1593_p5 = scmp.lt.u32.totalorder %s1591_s30, %s1586_s22 }
  0x1a   : > { %p1595_p8 = scmp.lt.u32.totalorder %s1586_s22, %s1793_s17 }
  0x1b   : > { %p1590_p3 = pneg %p1589_p2  ;;  %p1594_p7 = por %p1593_p5, %p1592_p4 }
  0x1d   : > { %p1596_p10 = por %p1595_p8, %p1594_p7 }
  0x1f   : > { %p1597_p9 = pnand %p1596_p10, %p1590_p3 }
  0x21   : > { %1600 = shalt.err (!%p1597_p9)
}
  0x22   : > { %s1601_s12 = scalar_lea.vmem %s1801_s19, 1024  ;;  %s1684_s14 = smov [#allocation3]  }
  0x23   : > { %p1602_p0 = scmp.ne.s32.totalorder %s1801_s19, %s1601_s12  ;;  %s1606_s15 = sshll.u32 %s1684_s14, 4  ;;  %s1607_s15 = int_to_ptr.vmem [resolvable:$false] %s1606_s15 }
  0x24   : > { %s1608_s16 = scalar_lea.vmem %s1607_s15, 2048  ;;  %p1609_p11 = scmp.lt.s32.totalorder %s1801_s19, %s1607_s15 }
  0x25   : > { %p1604_p2 = pnand %p1602_p0, %p1588_p1  ;;  %p1610_p4 = scmp.lt.s32.totalorder %s1608_s16, %s1601_s12 }
  0x27   : > { %p1605_p12 = pneg %p1604_p2  ;;  %p1611_p5 = por %p1610_p4, %p1609_p11 }
  0x29   : > { %p1612_p7 = pnand %p1611_p5, %p1605_p12 }
  0x2b   : > { %1615 = shalt.err (!%p1612_p7)
}
  0x2c   : > { %s1685_s18 = smov 256   ;;  %s1686_s22 = smov 16  }
  0x2d   : > { %1395 = dma.hbm_to_vmem [thread:$0]  (!%p1797_p13), %s1793_s17, 1024, %s1801_s19, %s1803_s21, %s1685_s18, %s1685_s18, %s1686_s22  }
  0x2e   : > { %p1353_p9 = scmp.ge.s32.totalorder %s1682_s26, 1  ;;  %p232_p1 = scmp.lt.s32.totalorder %s1682_s26, 3 }
  0x30   : > { %p233_p3 = pnand %p1353_p9, %p232_p1 }
  0x32   : > { %236 = sbr.rel (%p233_p3) target bundleno = 1468 (0x5bc), region = 44 }
  0x39   : > { %s1834_s27 = sand.u32 1, %s1674_s24  }
  0x3a   : > { %s1354_s29 = sshll.u32 %s1834_s27, 6  ;;  %s239_s30 = scalar_lea.sflag [#allocation4], %s1834_s27 }
  0x3b   : > { %s1840_s8 = scalar_lea.vmem [#allocation3], %s1354_s29 }
  0x3c   : > { %1661 = dma.done.wait (%p1773_p6), %s239_s30, 1024  }
  0x3d   : > { %1663 = vsyncadd (%p1773_p6), %s239_s30, 4294966272  ;;  %v2360_v0 = vmov 0   ;;  %v1442_v1 = vld [vmem:[%s2353_s1] sm:$0xff]   ;;  %v1443_v2 = vld [vmem:[%s2353_s1 + $0x8] sm:$0xff]   ;;  %vm327_vm0 = vcmask 261120   ;;  %v435_v50 = vlaneseq  ;;  %s273_s13 = sld [smem:[#allocation2]] }
  0x3e   : > { %366 = vmatprep.mubr.bf16.mxu0 %v2360_v0  ;;  %426 = vmatprep.mubr.bf16.mxu1 %v2360_v0  ;;  %v288_v3 = vld [vmem:[%s1840_s8 + $0x8] sm:$0xff]  ;;  %v290_v4 = vld [vmem:[%s1840_s8 + $0x18] sm:$0xff]  ;;  %v287_v5 = vld [vmem:[%s1840_s8] sm:$0xff]  ;;  %s2285_s12 = scalar_lea.vmem [#allocation6], %s1354_s29  ;;  %s1387_s14 = sshll.u32 %s1751_s5, 10 }
  0x3f   : > { %311 = vxpose.xlu0.c.b16.start [1/2] (short) (narrow) %v1442_v1, 32  ;;  %v1857_v6 = vpack.c.bf16 %v290_v4, %v288_v3  ;;  %v289_v7 = vld [vmem:[%s1840_s8 + $0x10] sm:$0xff]  ;;  %v292_v8 = vld [vmem:[%s1840_s8 + $0x28] sm:$0xff]  ;;  %v294_v9 = vld [vmem:[%s1840_s8 + $0x38] sm:$0xff]  ;;  %v436_v51 = vshrl.u32 %v435_v50, 7  ;;  %s1274_s29 = sshll.u32 %s2285_s12, 4  ;;  %s2304_s16 = scalar_lea.hbm %s2358_s6, %s1387_s14  ;;  %s2296_s29 = int_to_ptr.vmem [resolvable:$true] %s1274_s29 }
  0x40   : > { %v1862_v10 = vpack.c.bf16 %v289_v7, %v287_v5  ;;  %v1864_v11 = vpack.c.bf16 %v294_v9, %v292_v8  ;;  %v291_v12 = vld [vmem:[%s1840_s8 + $0x20] sm:$0xff]  ;;  %v293_v13 = vld [vmem:[%s1840_s8 + $0x30] sm:$0xff]  ;;  %s1261_s18 = scalar_lea.sflag [#allocation5], %s1834_s27  ;;  %s1616_s22 = scalar_lea.vmem %s2296_s29, 1024 }
  0x41   : > { %2386 = vst [vmem:[#allocation9_spill] sm:$0xff] %v1857_v6  ;;  %334 = vmatprep.subr.bf16.mxu0 %v1857_v6  ;;  %394 = vmatprep.subr.bf16.mxu1 %v1857_v6  ;;  %v1871_v14 = vpack.c.bf16 %v293_v13, %v291_v12  ;;  %v278_v17 = vld [vmem:[%s2354_s2] sm:$0x1]  ;;  %v1923_v52 = vsub.s32 0, %v436_v51  ;;  %p1617_p6 = scmp.ne.s32.totalorder %s2296_s29, %s1616_s22  ;;  %p2423_p11 = scmp.ne.s32.totalorder %s2383_s10, 0 }
  0x42   : > { %2387 = vst [vmem:[#allocation10_spill] sm:$0xff] %v1862_v10  ;;  %2388 = vst [vmem:[#allocation11_spill] sm:$0xff] %v1864_v11  ;;  %335 = vmatpush1.bf16.msra.mxu0 %v1862_v10  ;;  %395 = vmatpush1.bf16.msra.mxu1 %v1862_v10  ;;  %s1689_s30 = smov [#allocation6]  }
  0x43   : > { %312 = vxpose.xlu0.c.b16.end [2/2] (short) (narrow) %v1443_v2, 32  ;;  %2389 = vst [vmem:[#allocation12_spill] sm:$0xff] %v1871_v14  ;;  %336 = vmatprep.subr.bf16.mxu0 %v1864_v11  ;;  %2390 = vst [vmem:[#allocation13_spill] sm:$0xff] %v1923_v52  ;;  %p1618_p12 = pnand %p1617_p6, %p2423_p11  ;;  %s1620_s17 = sshll.u32 %s1689_s30, 4  ;;  %s1621_s17 = int_to_ptr.vmem [resolvable:$false] %s1620_s17 }
  0x44   : > { %396 = vmatprep.subr.bf16.mxu1 %v1864_v11  ;;  %s1622_s19 = scalar_lea.vmem %s1621_s17, 2048  ;;  %p1623_p8 = scmp.lt.s32.totalorder %s2296_s29, %s1621_s17 }
  0x45   : > { %p1619_p13 = pneg %p1618_p12  ;;  %p1624_p10 = scmp.lt.s32.totalorder %s1622_s19, %s1616_s22 }
  0x46   : > { %337 = vmatpush1.bf16.msra.mxu0 %v1871_v14  ;;  %397 = vmatpush1.bf16.msra.mxu1 %v1871_v14 }
  0x47   : > { %523 = vmatprep.subr.bf16.mxu1 %v1857_v6  ;;  %p1625_p0 = por %p1624_p10, %p1623_p8 }
  0x49   : > { %1360 = vmatmul.mubr.msk.bf16.vlgmr.msra.gmra.mrb[0].mxu1 %vm327_vm0, %v278_v17  ;;  %p1626_p2 = pnand %p1625_p0, %p1619_p13 }
  0x4a   : > { %524 = vmatpush1.bf16.msra.mxu1 %v1862_v10  ;;  %555 = vmatprep.mubr.bf16.mxu1 %v2360_v0 }
  0x4b   : > { %525 = vmatprep.subr.bf16.mxu1 %v1864_v11 }
  0x4e   : > { %526 = vmatpush1.bf16.msra.mxu1 %v1871_v14 }
  0xa5   : > { %v319_v15 = vpop.trf.xlu0 }
  0xa6   : > { %1358 = vmatmul.mubr.msk.bf16.vlgmr.msra.gmra.mrb[0].mxu0 %vm327_vm0, %v319_v15 }
  0xa7   : > { %376 = vmatprep.mubr.bf16.mxu0 %v2360_v0 }
  0xa9   : > { %v320_v16 = vpop.trf.xlu0 }
  0xae   : > { %1359 = vmatmul.mubr.msk.bf16.gmra.mrb[4].mxu0 %vm327_vm0, %v320_v16 }
 0x11c   : > { %v428_v30 = vpop.f32.mrb[0].mxu1 }
 0x11d   : > { %v430_v31 = vpop.f32.mrb[1].mxu1  ;;  %v1926_v53 = vrot.slane %v428_v30, %v1923_v52 }
 0x11e   : > { %v432_v32 = vpop.f32.mrb[2].mxu1  ;;  %v1929_v54 = vrot.slane %v430_v31, %v1923_v52 }
 0x11f   : > { %v433_v33 = vpop.f32.mrb[3].mxu1 }
 0x179   : > { %v368_v18 = vpop.f32.mrb[0].mxu0 }
 0x17a   : > { %v370_v19 = vpop.f32.mrb[1].mxu0 }
 0x17b   : > { %v372_v20 = vpop.f32.mrb[2].mxu0 }
 0x17c   : > { %v374_v21 = vpop.f32.mrb[3].mxu0  ;;  %v387_v22 = vpack.c.bf16 %v372_v20, %v368_v18 }
 0x17d   : > { %v388_v23 = vpack.c.bf16 %v374_v21, %v370_v19 }
 0x17e   : > { %443 = vxpose.xlu1.c.b16.start [1/2] (short) %v387_v22, 128 }
 0x17f   : > { %459 = vxpose.xlu0.c.b16.start [1/2] (short) %v388_v23, 128 }
 0x181   : > { %v378_v24 = vpop.f32.mrb[4].mxu0 }
 0x182   : > { %v380_v25 = vpop.f32.mrb[5].mxu0 }
 0x183   : > { %v382_v26 = vpop.f32.mrb[6].mxu0 }
 0x184   : > { %v389_v27 = vpack.c.bf16 %v382_v26, %v378_v24  ;;  %v384_v28 = vpop.f32.mrb[7].mxu0 }
 0x185   : > { %v390_v29 = vpack.c.bf16 %v384_v28, %v380_v25 }
 0x186   : > { %444 = vxpose.xlu1.c.b16.end [2/2] (short) %v389_v27, 128 }
 0x187   : > { %460 = vxpose.xlu0.c.b16.end [2/2] (short) %v390_v29, 128 }
 0x18a   : > { %1441 = vset.pattern.permute.xlu1 %v2360_v0 }
 0x190   : > { %1440 = vset.pattern.permute.xlu0 %v2360_v0 }
 0x1e8   : > { %v451_v34 = vpop.trf.xlu1 }
 0x1e9   : > { %1361 = vmatmul.mubr.msk.bf16.vlgmr.msra.gmra.mrb[4].mxu1 %vm327_vm0, %v451_v34  ;;  %v467_v42 = vpop.trf.xlu0 }
 0x1ea   : > { %565 = vmatprep.mubr.bf16.mxu1 %v2360_v0 }
 0x1ec   : > { %v452_v35 = vpop.trf.xlu1 }
 0x1ed   : > { %v468_v43 = vpop.trf.xlu0 }
 0x1f0   : > { %v453_v36 = vpop.trf.xlu1 }
 0x1f1   : > { %1362 = vmatmul.mubr.msk.bf16.gmra.mrb[8].mxu1 %vm327_vm0, %v452_v35  ;;  %v469_v44 = vpop.trf.xlu0 }
 0x1f2   : > { %575 = vmatprep.mubr.bf16.mxu1 %v2360_v0 }
 0x1f4   : > { %v454_v37 = vpop.trf.xlu1 }
 0x1f5   : > { %v470_v45 = vpop.trf.xlu0 }
 0x1f8   : > { %v455_v38 = vpop.trf.xlu1 }
 0x1f9   : > { %1363 = vmatmul.mubr.msk.bf16.gmra.mrb[12].mxu1 %vm327_vm0, %v453_v36  ;;  %v471_v46 = vpop.trf.xlu0 }
 0x1fa   : > { %585 = vmatprep.mubr.bf16.mxu1 %v2360_v0 }
 0x1fc   : > { %v456_v39 = vpop.trf.xlu1 }
 0x1fd   : > { %v472_v47 = vpop.trf.xlu0 }
 0x200   : > { %v457_v40 = vpop.trf.xlu1 }
 0x201   : > { %1364 = vmatmul.mubr.msk.bf16.gmra.mrb[16].mxu1 %vm327_vm0, %v454_v37  ;;  %v473_v48 = vpop.trf.xlu0 }
 0x202   : > { %595 = vmatprep.mubr.bf16.mxu1 %v2360_v0 }
 0x204   : > { %v458_v41 = vpop.trf.xlu1 }
 0x205   : > { %v474_v49 = vpop.trf.xlu0 }
 0x209   : > { %1365 = vmatmul.mubr.msk.bf16.gmra.mrb[20].mxu1 %vm327_vm0, %v455_v38 }
 0x20a   : > { %605 = vmatprep.mubr.bf16.mxu1 %v2360_v0 }
 0x211   : > { %1366 = vmatmul.mubr.msk.bf16.gmra.mrb[24].mxu1 %vm327_vm0, %v456_v39 }
 0x212   : > { %615 = vmatprep.mubr.bf16.mxu1 %v2360_v0 }
 0x219   : > { %1367 = vmatmul.mubr.msk.bf16.gmra.mrb[28].mxu1 %vm327_vm0, %v457_v40 }
 0x21a   : > { %625 = vmatprep.mubr.bf16.mxu1 %v2360_v0 }
 0x221   : > { %1368 = vmatmul.mubr.msk.bf16.gmra.mrb[32].mxu1 %vm327_vm0, %v458_v41 }
 0x222   : > { %635 = vmatprep.mubr.bf16.mxu1 %v2360_v0 }
 0x229   : > { %1369 = vmatmul.mubr.msk.bf16.gmra.mrb[36].mxu1 %vm327_vm0, %v467_v42 }
 0x22a   : > { %645 = vmatprep.mubr.bf16.mxu1 %v2360_v0 }
 0x231   : > { %1370 = vmatmul.mubr.msk.bf16.gmra.mrb[40].mxu1 %vm327_vm0, %v468_v43 }
 0x232   : > { %655 = vmatprep.mubr.bf16.mxu1 %v2360_v0 }
 0x239   : > { %1371 = vmatmul.mubr.msk.bf16.gmra.mrb[44].mxu1 %vm327_vm0, %v469_v44 }
 0x23a   : > { %665 = vmatprep.mubr.bf16.mxu1 %v2360_v0 }
 0x241   : > { %1372 = vmatmul.mubr.msk.bf16.gmra.mrb[48].mxu1 %vm327_vm0, %v470_v45 }
 0x242   : > { %675 = vmatprep.mubr.bf16.mxu1 %v2360_v0 }
 0x249   : > { %1373 = vmatmul.mubr.msk.bf16.gmra.mrb[52].mxu1 %vm327_vm0, %v471_v46 }
 0x24a   : > { %685 = vmatprep.mubr.bf16.mxu1 %v2360_v0 }
 0x251   : > { %1374 = vmatmul.mubr.msk.bf16.gmra.mrb[56].mxu1 %vm327_vm0, %v472_v47 }
 0x252   : > { %695 = vmatprep.mubr.bf16.mxu1 %v2360_v0 }
 0x259   : > { %1375 = vmatmul.mubr.msk.bf16.gmra.mrb[60].mxu1 %vm327_vm0, %v473_v48 }
 0x25a   : > { %705 = vmatprep.mubr.bf16.mxu1 %v2360_v0 }
 0x261   : > { %1376 = vmatmul.mubr.msk.bf16.gmra.mrb[64].mxu1 %vm327_vm0, %v474_v49 }
 0x2bc   : > { %v557_v55 = vpop.f32.mrb[4].mxu1 }
 0x2bd   : > { %v1932_v56 = vadd.f32 %v557_v55, %v1926_v53  ;;  %v559_v57 = vpop.f32.mrb[5].mxu1 }
 0x2be   : > { %v1935_v58 = vadd.f32 %v559_v57, %v1929_v54  ;;  %v561_v59 = vpop.f32.mrb[6].mxu1 }
 0x2bf   : > { %v1938_v60 = vadd.f32 %v561_v59, %v1926_v53  ;;  %v563_v61 = vpop.f32.mrb[7].mxu1 }
 0x2c0   : > { %v1941_v62 = vadd.f32 %v563_v61, %v1929_v54  ;;  %v716_v63 = vmax.f32 %v1932_v56, %v1935_v58 }
 0x2c2   : > { %717 = vmax.xlane.f32.xlu1 %v716_v63  ;;  %v719_v1 = vmax.f32 %v1938_v60, %v1941_v62 }
 0x2c4   : > { %v567_v2 = vpop.f32.mrb[8].mxu1  ;;  %720 = vmax.xlane.f32.xlu0 %v719_v1 }
 0x2c5   : > { %v1948_v3 = vadd.f32 %v567_v2, %v1926_v53  ;;  %v569_v4 = vpop.f32.mrb[9].mxu1 }
 0x2c6   : > { %v1951_v5 = vadd.f32 %v569_v4, %v1929_v54  ;;  %v571_v7 = vpop.f32.mrb[10].mxu1 }
 0x2c7   : > { %v573_v8 = vpop.f32.mrb[11].mxu1  ;;  %v1954_v9 = vadd.f32 %v571_v7, %v1926_v53 }
 0x2c8   : > { %v1957_v12 = vadd.f32 %v573_v8, %v1929_v54  ;;  %v722_v13 = vmax.f32 %v1948_v3, %v1951_v5 }
 0x2ca   : > { %723 = vmax.xlane.f32.xlu1 %v722_v13  ;;  %v725_v16 = vmax.f32 %v1954_v9, %v1957_v12 }
 0x2cc   : > { %v577_v15 = vpop.f32.mrb[12].mxu1 }
 0x2cd   : > { %v1964_v17 = vadd.f32 %v577_v15, %v1926_v53  ;;  %v579_v18 = vpop.f32.mrb[13].mxu1 }
 0x2ce   : > { %v1967_v19 = vadd.f32 %v579_v18, %v1929_v54  ;;  %726 = vmax.xlane.f32.xlu1 %v725_v16  ;;  %v581_v20 = vpop.f32.mrb[14].mxu1 }
 0x2cf   : > { %v1970_v21 = vadd.f32 %v581_v20, %v1926_v53  ;;  %v583_v22 = vpop.f32.mrb[15].mxu1 }
 0x2d0   : > { %v1973_v23 = vadd.f32 %v583_v22, %v1929_v54  ;;  %v728_v24 = vmax.f32 %v1964_v17, %v1967_v19 }
 0x2d2   : > { %729 = vmax.xlane.f32.xlu0 %v728_v24  ;;  %v731_v25 = vmax.f32 %v1970_v21, %v1973_v23 }
 0x2d4   : > { %732 = vmax.xlane.f32.xlu1 %v731_v25  ;;  %v587_v26 = vpop.f32.mrb[16].mxu1 }
 0x2d5   : > { %v1980_v27 = vadd.f32 %v587_v26, %v1926_v53  ;;  %v589_v28 = vpop.f32.mrb[17].mxu1 }
 0x2d6   : > { %v1983_v29 = vadd.f32 %v589_v28, %v1929_v54  ;;  %v591_v30 = vpop.f32.mrb[18].mxu1 }
 0x2d7   : > { %v1986_v31 = vadd.f32 %v591_v30, %v1926_v53  ;;  %v593_v32 = vpop.f32.mrb[19].mxu1 }
 0x2d8   : > { %v1989_v33 = vadd.f32 %v593_v32, %v1929_v54  ;;  %v734_v34 = vmax.f32 %v1980_v27, %v1983_v29 }
 0x2da   : > { %735 = vmax.xlane.f32.xlu0 %v734_v34  ;;  %v737_v35 = vmax.f32 %v1986_v31, %v1989_v33 }
 0x2dc   : > { %738 = vmax.xlane.f32.xlu1 %v737_v35  ;;  %v597_v36 = vpop.f32.mrb[20].mxu1 }
 0x2dd   : > { %v1996_v37 = vadd.f32 %v597_v36, %v1926_v53  ;;  %v599_v38 = vpop.f32.mrb[21].mxu1 }
 0x2de   : > { %v1999_v39 = vadd.f32 %v599_v38, %v1929_v54  ;;  %v601_v40 = vpop.f32.mrb[22].mxu1 }
 0x2df   : > { %v2002_v41 = vadd.f32 %v601_v40, %v1926_v53  ;;  %v603_v42 = vpop.f32.mrb[23].mxu1 }
 0x2e0   : > { %v2005_v43 = vadd.f32 %v603_v42, %v1929_v54  ;;  %v740_v44 = vmax.f32 %v1996_v37, %v1999_v39 }
 0x2e2   : > { %741 = vmax.xlane.f32.xlu0 %v740_v44  ;;  %v743_v45 = vmax.f32 %v2002_v41, %v2005_v43 }
 0x2e4   : > { %744 = vmax.xlane.f32.xlu1 %v743_v45  ;;  %v607_v46 = vpop.f32.mrb[24].mxu1 }
 0x2e5   : > { %v2012_v47 = vadd.f32 %v607_v46, %v1926_v53  ;;  %v609_v48 = vpop.f32.mrb[25].mxu1 }
 0x2e6   : > { %v2015_v49 = vadd.f32 %v609_v48, %v1929_v54  ;;  %v611_v50 = vpop.f32.mrb[26].mxu1 }
 0x2e7   : > { %v2018_v51 = vadd.f32 %v611_v50, %v1926_v53  ;;  %v613_v55 = vpop.f32.mrb[27].mxu1 }
 0x2e8   : > { %v2021_v57 = vadd.f32 %v613_v55, %v1929_v54  ;;  %v746_v59 = vmax.f32 %v2012_v47, %v2015_v49 }
 0x2ea   : > { %747 = vmax.xlane.f32.xlu0 %v746_v59  ;;  %v749_v61 = vmax.f32 %v2018_v51, %v2021_v57 }
 0x2ec   : > { %750 = vmax.xlane.f32.xlu1 %v749_v61  ;;  %v617_v63 = vpop.f32.mrb[28].mxu1 }
 0x2ed   : > { %v2028_v1 = vadd.f32 %v617_v63, %v1926_v53  ;;  %v619_v2 = vpop.f32.mrb[29].mxu1 }
 0x2ee   : > { %v2031_v4 = vadd.f32 %v619_v2, %v1929_v54  ;;  %v621_v7 = vpop.f32.mrb[30].mxu1 }
 0x2ef   : > { %v2034_v8 = vadd.f32 %v621_v7, %v1926_v53  ;;  %v623_v13 = vpop.f32.mrb[31].mxu1 }
 0x2f0   : > { %v2037_v15 = vadd.f32 %v623_v13, %v1929_v54  ;;  %v752_v16 = vmax.f32 %v2028_v1, %v2031_v4 }
 0x2f2   : > { %753 = vmax.xlane.f32.xlu0 %v752_v16  ;;  %v755_v18 = vmax.f32 %v2034_v8, %v2037_v15 }
 0x2f4   : > { %756 = vmax.xlane.f32.xlu1 %v755_v18  ;;  %v627_v20 = vpop.f32.mrb[32].mxu1 }
 0x2f5   : > { %v2044_v22 = vadd.f32 %v627_v20, %v1926_v53  ;;  %v629_v24 = vpop.f32.mrb[33].mxu1 }
 0x2f6   : > { %v2047_v25 = vadd.f32 %v629_v24, %v1929_v54  ;;  %v631_v26 = vpop.f32.mrb[34].mxu1 }
 0x2f7   : > { %v2050_v28 = vadd.f32 %v631_v26, %v1926_v53  ;;  %v633_v30 = vpop.f32.mrb[35].mxu1 }
 0x2f8   : > { %v2053_v32 = vadd.f32 %v633_v30, %v1929_v54  ;;  %v758_v34 = vmax.f32 %v2044_v22, %v2047_v25 }
 0x2fa   : > { %759 = vmax.xlane.f32.xlu0 %v758_v34  ;;  %v761_v35 = vmax.f32 %v2050_v28, %v2053_v32 }
 0x2fc   : > { %762 = vmax.xlane.f32.xlu1 %v761_v35  ;;  %v637_v36 = vpop.f32.mrb[36].mxu1 }
 0x2fd   : > { %v2060_v38 = vadd.f32 %v637_v36, %v1926_v53  ;;  %v639_v40 = vpop.f32.mrb[37].mxu1 }
 0x2fe   : > { %v2063_v42 = vadd.f32 %v639_v40, %v1929_v54  ;;  %v641_v44 = vpop.f32.mrb[38].mxu1 }
 0x2ff   : > { %v2066_v45 = vadd.f32 %v641_v44, %v1926_v53  ;;  %v643_v46 = vpop.f32.mrb[39].mxu1 }
 0x300   : > { %v2069_v48 = vadd.f32 %v643_v46, %v1929_v54  ;;  %v764_v50 = vmax.f32 %v2060_v38, %v2063_v42 }
 0x302   : > { %765 = vmax.xlane.f32.xlu0 %v764_v50  ;;  %v767_v55 = vmax.f32 %v2066_v45, %v2069_v48 }
 0x304   : > { %768 = vmax.xlane.f32.xlu1 %v767_v55  ;;  %v647_v59 = vpop.f32.mrb[40].mxu1 }
 0x305   : > { %v2076_v61 = vadd.f32 %v647_v59, %v1926_v53  ;;  %v649_v63 = vpop.f32.mrb[41].mxu1 }
 0x306   : > { %v2079_v2 = vadd.f32 %v649_v63, %v1929_v54  ;;  %v651_v7 = vpop.f32.mrb[42].mxu1 }
 0x307   : > { %v2082_v13 = vadd.f32 %v651_v7, %v1926_v53  ;;  %v653_v16 = vpop.f32.mrb[43].mxu1 }
 0x308   : > { %v2085_v18 = vadd.f32 %v653_v16, %v1929_v54  ;;  %v770_v20 = vmax.f32 %v2076_v61, %v2079_v2 }
 0x30a   : > { %771 = vmax.xlane.f32.xlu0 %v770_v20  ;;  %v773_v24 = vmax.f32 %v2082_v13, %v2085_v18 }
 0x30c   : > { %774 = vmax.xlane.f32.xlu1 %v773_v24  ;;  %v657_v26 = vpop.f32.mrb[44].mxu1 }
 0x30d   : > { %v2092_v30 = vadd.f32 %v657_v26, %v1926_v53  ;;  %v659_v34 = vpop.f32.mrb[45].mxu1 }
 0x30e   : > { %v2095_v35 = vadd.f32 %v659_v34, %v1929_v54  ;;  %v661_v36 = vpop.f32.mrb[46].mxu1 }
 0x30f   : > { %v2098_v40 = vadd.f32 %v661_v36, %v1926_v53  ;;  %v663_v44 = vpop.f32.mrb[47].mxu1 }
 0x310   : > { %v2101_v46 = vadd.f32 %v663_v44, %v1929_v54  ;;  %v776_v50 = vmax.f32 %v2092_v30, %v2095_v35 }
 0x312   : > { %777 = vmax.xlane.f32.xlu0 %v776_v50  ;;  %v779_v55 = vmax.f32 %v2098_v40, %v2101_v46 }
 0x314   : > { %780 = vmax.xlane.f32.xlu1 %v779_v55  ;;  %v667_v59 = vpop.f32.mrb[48].mxu1 }
 0x315   : > { %v2108_v63 = vadd.f32 %v667_v59, %v1926_v53  ;;  %v669_v7 = vpop.f32.mrb[49].mxu1 }
 0x316   : > { %v2111_v16 = vadd.f32 %v669_v7, %v1929_v54  ;;  %v671_v20 = vpop.f32.mrb[50].mxu1 }
 0x317   : > { %v2114_v24 = vadd.f32 %v671_v20, %v1926_v53  ;;  %v673_v26 = vpop.f32.mrb[51].mxu1 }
 0x318   : > { %v2117_v34 = vadd.f32 %v673_v26, %v1929_v54  ;;  %v782_v36 = vmax.f32 %v2108_v63, %v2111_v16 }
 0x31a   : > { %783 = vmax.xlane.f32.xlu0 %v782_v36  ;;  %v785_v44 = vmax.f32 %v2114_v24, %v2117_v34 }
 0x31c   : > { %786 = vmax.xlane.f32.xlu1 %v785_v44  ;;  %v677_v50 = vpop.f32.mrb[52].mxu1 }
 0x31d   : > { %v2124_v55 = vadd.f32 %v677_v50, %v1926_v53  ;;  %v679_v59 = vpop.f32.mrb[53].mxu1 }
 0x31e   : > { %v2127_v7 = vadd.f32 %v679_v59, %v1929_v54  ;;  %v681_v20 = vpop.f32.mrb[54].mxu1 }
 0x31f   : > { %2391 = vst [vmem:[#allocation14_spill] sm:$0xff] %v2124_v55  ;;  %v2130_v26 = vadd.f32 %v681_v20, %v1926_v53  ;;  %v683_v0 = vpop.f32.mrb[55].mxu1 }
 0x320   : > { %2392 = vst [vmem:[#allocation15_spill] sm:$0xff] %v2127_v7  ;;  %v2133_v52 = vadd.f32 %v683_v0, %v1929_v54  ;;  %v788_v36 = vmax.f32 %v2124_v55, %v2127_v7 }
 0x321   : > { %2393 = vst [vmem:[#allocation16_spill] sm:$0xff] %v2130_v26 }
 0x322   : > { %2394 = vst [vmem:[#allocation17_spill] sm:$0xff] %v2133_v52  ;;  %789 = vmax.xlane.f32.xlu0 %v788_v36  ;;  %v791_v44 = vmax.f32 %v2130_v26, %v2133_v52 }
 0x324   : > { %792 = vmax.xlane.f32.xlu1 %v791_v44  ;;  %v687_v50 = vpop.f32.mrb[56].mxu1 }
 0x325   : > { %v2140_v59 = vadd.f32 %v687_v50, %v1926_v53  ;;  %v689_v14 = vpop.f32.mrb[57].mxu1 }
 0x326   : > { %v2143_v20 = vadd.f32 %v689_v14, %v1929_v54  ;;  %v691_v11 = vpop.f32.mrb[58].mxu1 }
 0x327   : > { %2395 = vst [vmem:[#allocation18_spill] sm:$0xff] %v2140_v59  ;;  %v2146_v0 = vadd.f32 %v691_v11, %v1926_v53  ;;  %v693_v10 = vpop.f32.mrb[59].mxu1 }
 0x328   : > { %2396 = vst [vmem:[#allocation19_spill] sm:$0xff] %v2143_v20  ;;  %v2149_v6 = vadd.f32 %v693_v10, %v1929_v54  ;;  %v794_v36 = vmax.f32 %v2140_v59, %v2143_v20 }
 0x329   : > { %2397 = vst [vmem:[#allocation20_spill] sm:$0xff] %v2146_v0 }
 0x32a   : > { %2398 = vst [vmem:[#allocation21_spill] sm:$0xff] %v2149_v6  ;;  %795 = vmax.xlane.f32.xlu0 %v794_v36  ;;  %v797_v44 = vmax.f32 %v2146_v0, %v2149_v6 }
 0x32c   : > { %798 = vmax.xlane.f32.xlu1 %v797_v44  ;;  %v697_v50 = vpop.f32.mrb[60].mxu1 }
 0x32d   : > { %v2156_v14 = vadd.f32 %v697_v50, %v1926_v53  ;;  %v699_v52 = vpop.f32.mrb[61].mxu1 }
 0x32e   : > { %v2159_v11 = vadd.f32 %v699_v52, %v1929_v54  ;;  %v701_v26 = vpop.f32.mrb[62].mxu1 }
 0x32f   : > { %2399 = vst [vmem:[#allocation22_spill] sm:$0xff] %v2156_v14  ;;  %v2162_v10 = vadd.f32 %v701_v26, %v1926_v53  ;;  %v703_v55 = vpop.f32.mrb[63].mxu1 }
 0x330   : > { %2400 = vst [vmem:[#allocation23_spill] sm:$0xff] %v2159_v11  ;;  %v2165_v59 = vadd.f32 %v703_v55, %v1929_v54  ;;  %v800_v36 = vmax.f32 %v2156_v14, %v2159_v11 }
 0x331   : > { %2401 = vst [vmem:[#allocation24_spill] sm:$0xff] %v2162_v10 }
 0x332   : > { %2402 = vst [vmem:[#allocation25_spill] sm:$0xff] %v2165_v59  ;;  %801 = vmax.xlane.f32.xlu0 %v800_v36  ;;  %v803_v44 = vmax.f32 %v2162_v10, %v2165_v59 }
 0x334   : > { %804 = vmax.xlane.f32.xlu1 %v803_v44  ;;  %v707_v50 = vpop.f32.mrb[64].mxu1 }
 0x335   : > { %v2172_v52 = vadd.f32 %v707_v50, %v1926_v53  ;;  %v709_v6 = vpop.f32.mrb[65].mxu1 }
 0x336   : > { %v2175_v26 = vadd.f32 %v709_v6, %v1929_v54  ;;  %v711_v0 = vpop.f32.mrb[66].mxu1 }
 0x337   : > { %v2178_v55 = vadd.f32 %v711_v0, %v1926_v53  ;;  %v713_v20 = vpop.f32.mrb[67].mxu1 }
 0x338   : > { %v2181_v14 = vadd.f32 %v713_v20, %v1929_v54  ;;  %v806_v36 = vmax.f32 %v2172_v52, %v2175_v26 }
 0x33a   : > { %2403 = vst [vmem:[#allocation26_spill] sm:$0xff] %v2181_v14  ;;  %807 = vmax.xlane.f32.xlu0 %v806_v36  ;;  %v809_v44 = vmax.f32 %v2178_v55, %v2181_v14 }
 0x33c   : > { %810 = vmax.xlane.f32.xlu1 %v809_v44 }
 0x34f   : > { %v718_v50 = vpop.xlane.xlu1 %717 }
 0x350   : > { %v812_v6 = vsub.f32 %v1932_v56, %v718_v50  ;;  %v813_v59 = vsub.f32 %v1935_v58, %v718_v50 }
 0x351   : > { %v721_v10 = vpop.xlane.xlu0 %720 }
 0x352   : > { %v876_v53 = vmul.f32 1.442695, %v812_v6  ;;  %v814_v0 = vsub.f32 %v1938_v60, %v721_v10  ;;  %v815_v54 = vsub.f32 %v1941_v62, %v721_v10  ;;  %v878_v20 = vmul.f32 1.442695, %v813_v59 }
 0x354   : > { %v880_v11 = vmul.f32 1.442695, %v814_v0  ;;  %v882_v7 = vmul.f32 1.442695, %v815_v54  ;;  %1446 = vpow2.f32 %v876_v53 }
 0x356   : > { %1448 = vpow2.f32 %v880_v11 }
 0x357   : > { %1450 = vpow2.f32 %v882_v7  ;;  %v724_v36 = vpop.xlane.xlu1 %723 }
 0x358   : > { %1452 = vpow2.f32 %v878_v20  ;;  %v816_v44 = vsub.f32 %v1948_v3, %v724_v36  ;;  %v817_v56 = vsub.f32 %v1951_v5, %v724_v36  ;;  %v1688_v3 = vmov 1065369472  }
 0x359   : > { %1068 = vmatprep.mubr.bf16.mxu0 %v1688_v3 }
 0x35a   : > { %v884_v14 = vmul.f32 1.442695, %v816_v44  ;;  %v886_v58 = vmul.f32 1.442695, %v817_v56 }
 0x35b   : > { %v727_v50 = vpop.xlane.xlu1 %726 }
 0x35c   : > { %v818_v6 = vsub.f32 %v1954_v9, %v727_v50  ;;  %v819_v60 = vsub.f32 %v1957_v12, %v727_v50  ;;  %1454 = vpow2.f32 %v884_v14 }
 0x35d   : > { %1456 = vpow2.f32 %v886_v58 }
 0x35e   : > { %v888_v62 = vmul.f32 1.442695, %v818_v6  ;;  %v890_v59 = vmul.f32 1.442695, %v819_v60  ;;  %v1447_v10 = vpop.eup %1446 }
 0x35f   : > { %v730_v11 = vpop.xlane.xlu0 %729 }
 0x360   : > { %v1449_v7 = vpop.eup %1448  ;;  %1458 = vpow2.f32 %v888_v62  ;;  %v821_v53 = vsub.f32 %v1967_v19, %v730_v11  ;;  %v820_v0 = vsub.f32 %v1964_v17, %v730_v11 }
 0x361   : > { %v1451_v5 = vpop.eup %1450  ;;  %1460 = vpow2.f32 %v890_v59  ;;  %v733_v9 = vpop.xlane.xlu1 %732  ;;  %v1004_v36 = vpack.c.bf16 %v1449_v7, %v1447_v10 }
 0x362   : > { %v1453_v54 = vpop.eup %1452  ;;  %v894_v12 = vmul.f32 1.442695, %v821_v53  ;;  %v822_v14 = vsub.f32 %v1970_v21, %v733_v9  ;;  %v823_v20 = vsub.f32 %v1973_v23, %v733_v9  ;;  %v892_v50 = vmul.f32 1.442695, %v820_v0 }
 0x363   : > { %v1005_v44 = vpack.c.bf16 %v1451_v5, %v1453_v54 }
 0x364   : > { %v896_v56 = vmul.f32 1.442695, %v822_v14  ;;  %v898_v58 = vmul.f32 1.442695, %v823_v20  ;;  %1462 = vpow2.f32 %v894_v12 }
 0x365   : > { %1036 = vmatprep.subr.bf16.mxu0 %v1005_v44  ;;  %1175 = vmatprep.subr.bf16.mxu1 %v1005_v44 }
 0x366   : > { %1037 = vmatpush1.bf16.xpose.msra.mxu0 %v1004_v36  ;;  %1176 = vmatpush1.bf16.xpose.msra.mxu1 %v1004_v36  ;;  %1464 = vpow2.f32 %v898_v58  ;;  %v1455_v17 = vpop.eup %1454 }
 0x367   : > { %v736_v19 = vpop.xlane.xlu0 %735  ;;  %1466 = vpow2.f32 %v896_v56  ;;  %v1457_v60 = vpop.eup %1456 }
 0x368   : > { %v825_v6 = vsub.f32 %v1983_v29, %v736_v19  ;;  %1468 = vpow2.f32 %v892_v50  ;;  %v824_v62 = vsub.f32 %v1980_v27, %v736_v19 }
 0x369   : > { %v739_v21 = vpop.xlane.xlu1 %738 }
 0x36a   : > { %v1459_v23 = vpop.eup %1458  ;;  %v902_v59 = vmul.f32 1.442695, %v825_v6  ;;  %v826_v10 = vsub.f32 %v1986_v31, %v739_v21  ;;  %v827_v11 = vsub.f32 %v1989_v33, %v739_v21  ;;  %v900_v54 = vmul.f32 1.442695, %v824_v62 }
 0x36b   : > { %v1461_v7 = vpop.eup %1460  ;;  %v1006_v53 = vpack.c.bf16 %v1459_v23, %v1455_v17 }
 0x36c   : > { %v904_v5 = vmul.f32 1.442695, %v826_v10  ;;  %v906_v0 = vmul.f32 1.442695, %v827_v11  ;;  %v1007_v9 = vpack.c.bf16 %v1461_v7, %v1457_v60  ;;  %1470 = vpow2.f32 %v902_v59  ;;  %v285_v59 = vld [vmem:[%s2356_s4 + $0x10] sm:$0xff] }
 0x36e   : > { %1038 = vmatprep.subr.bf16.mxu0 %v1007_v9  ;;  %1177 = vmatprep.subr.bf16.mxu1 %v1007_v9  ;;  %1472 = vpow2.f32 %v906_v0  ;;  %v1463_v12 = vpop.eup %1462 }
 0x36f   : > { %1039 = vmatpush1.bf16.xpose.msra.mxu0 %v1006_v53  ;;  %1178 = vmatpush1.bf16.xpose.msra.mxu1 %v1006_v53  ;;  %v742_v29 = vpop.xlane.xlu0 %741  ;;  %1474 = vpow2.f32 %v904_v5 }
 0x370   : > { %v829_v27 = vsub.f32 %v1999_v39, %v742_v29  ;;  %v1465_v31 = vpop.eup %1464  ;;  %v828_v33 = vsub.f32 %v1996_v37, %v742_v29  ;;  %1476 = vpow2.f32 %v900_v54  ;;  %v284_v37 = vld [vmem:[%s2356_s4 + $0x8] sm:$0xff]  ;;  %v283_v39 = vld [vmem:[%s2356_s4] sm:$0xff] }
 0x371   : > { %v745_v14 = vpop.xlane.xlu1 %744  ;;  %v1467_v20 = vpop.eup %1466  ;;  %v1009_v50 = vpack.c.bf16 %v1465_v31, %v1463_v12  ;;  %1089 = vperm.xlu1 %1441, %v284_v37   ;;  %1084 = vperm.xlu0 %1440, %v283_v39   ;;  %v286_v12 = vld [vmem:[%s2356_s4 + $0x18] sm:$0xff] }
 0x372   : > { %v910_v36 = vmul.f32 1.442695, %v829_v27  ;;  %v830_v44 = vsub.f32 %v2002_v41, %v745_v14  ;;  %v831_v56 = vsub.f32 %v2005_v43, %v745_v14  ;;  %v1469_v58 = vpop.eup %1468  ;;  %v908_v6 = vmul.f32 1.442695, %v828_v33 }
 0x373   : > { %1040 = vmatprep.subr.bf16.mxu0 %v1009_v50  ;;  %1179 = vmatprep.subr.bf16.mxu1 %v1009_v50  ;;  %v1008_v60 = vpack.c.bf16 %v1467_v20, %v1469_v58 }
 0x374   : > { %v912_v19 = vmul.f32 1.442695, %v830_v44  ;;  %v914_v17 = vmul.f32 1.442695, %v831_v56  ;;  %1478 = vpow2.f32 %v910_v36 }
 0x375   : > { %1094 = vperm.xlu1 %1441, %v285_v59  }
 0x376   : > { %1480 = vpow2.f32 %v914_v17  ;;  %v1471_v43 = vpop.eup %1470 }
 0x377   : > { %1041 = vmatpush1.bf16.xpose.msra.mxu0 %v1008_v60  ;;  %1180 = vmatpush1.bf16.xpose.msra.mxu1 %v1008_v60  ;;  %v748_v41 = vpop.xlane.xlu0 %747  ;;  %1482 = vpow2.f32 %v912_v19 }
 0x378   : > { %v833_v21 = vsub.f32 %v2015_v49, %v748_v41  ;;  %v1473_v23 = vpop.eup %1472  ;;  %1484 = vpow2.f32 %v908_v6  ;;  %v832_v11 = vsub.f32 %v2012_v47, %v748_v41 }
 0x379   : > { %v751_v62 = vpop.xlane.xlu1 %750  ;;  %v1475_v10 = vpop.eup %1474  ;;  %v1011_v0 = vpack.c.bf16 %v1473_v23, %v1471_v43  ;;  %1099 = vperm.xlu1 %1441, %v286_v12  }
 0x37a   : > { %v918_v7 = vmul.f32 1.442695, %v833_v21  ;;  %v834_v53 = vsub.f32 %v2018_v51, %v751_v62  ;;  %v835_v5 = vsub.f32 %v2021_v57, %v751_v62  ;;  %v1477_v9 = vpop.eup %1476  ;;  %v916_v27 = vmul.f32 1.442695, %v832_v11 }
 0x37b   : > { %1042 = vmatprep.subr.bf16.mxu0 %v1011_v0  ;;  %1181 = vmatprep.subr.bf16.mxu1 %v1011_v0  ;;  %v1010_v29 = vpack.c.bf16 %v1475_v10, %v1477_v9 }
 0x37c   : > { %v920_v49 = vmul.f32 1.442695, %v834_v53  ;;  %v922_v54 = vmul.f32 1.442695, %v835_v5  ;;  %1486 = vpow2.f32 %v918_v7 }
 0x37e   : > { %1488 = vpow2.f32 %v922_v54  ;;  %v1479_v51 = vpop.eup %1478 }
 0x37f   : > { %1043 = vmatpush1.bf16.xpose.msra.mxu0 %v1010_v29  ;;  %1182 = vmatpush1.bf16.xpose.msra.mxu1 %v1010_v29  ;;  %v754_v47 = vpop.xlane.xlu0 %753  ;;  %1490 = vpow2.f32 %v920_v49 }
 0x380   : > { %v837_v57 = vsub.f32 %v2031_v4, %v754_v47  ;;  %v1481_v31 = vpop.eup %1480  ;;  %v836_v33 = vsub.f32 %v2028_v1, %v754_v47  ;;  %1492 = vpow2.f32 %v916_v27 }
 0x381   : > { %v757_v14 = vpop.xlane.xlu1 %756  ;;  %v1483_v20 = vpop.eup %1482  ;;  %v1013_v50 = vpack.c.bf16 %v1481_v31, %v1479_v51 }
 0x382   : > { %v926_v36 = vmul.f32 1.442695, %v837_v57  ;;  %v838_v44 = vsub.f32 %v2034_v8, %v757_v14  ;;  %v839_v56 = vsub.f32 %v2037_v15, %v757_v14  ;;  %v1485_v58 = vpop.eup %1484  ;;  %v924_v6 = vmul.f32 1.442695, %v836_v33 }
 0x383   : > { %1044 = vmatprep.subr.bf16.mxu0 %v1013_v50  ;;  %1183 = vmatprep.subr.bf16.mxu1 %v1013_v50  ;;  %v1012_v4 = vpack.c.bf16 %v1483_v20, %v1485_v58 }
 0x384   : > { %v928_v19 = vmul.f32 1.442695, %v838_v44  ;;  %v930_v17 = vmul.f32 1.442695, %v839_v56  ;;  %1494 = vpow2.f32 %v926_v36 }
 0x386   : > { %1496 = vpow2.f32 %v930_v17  ;;  %v1487_v60 = vpop.eup %1486 }
 0x387   : > { %1045 = vmatpush1.bf16.xpose.msra.mxu0 %v1012_v4  ;;  %1184 = vmatpush1.bf16.xpose.msra.mxu1 %v1012_v4  ;;  %v760_v1 = vpop.xlane.xlu0 %759  ;;  %1498 = vpow2.f32 %v928_v19 }
 0x388   : > { %v841_v37 = vsub.f32 %v2047_v25, %v760_v1  ;;  %v1489_v8 = vpop.eup %1488  ;;  %1500 = vpow2.f32 %v924_v6  ;;  %v840_v41 = vsub.f32 %v2044_v22, %v760_v1 }
 0x389   : > { %v763_v15 = vpop.xlane.xlu1 %762  ;;  %v1491_v39 = vpop.eup %1490  ;;  %v1015_v62 = vpack.c.bf16 %v1489_v8, %v1487_v60 }
 0x38a   : > { %v934_v43 = vmul.f32 1.442695, %v841_v37  ;;  %v842_v21 = vsub.f32 %v2050_v28, %v763_v15  ;;  %v843_v23 = vsub.f32 %v2053_v32, %v763_v15  ;;  %v1493_v59 = vpop.eup %1492  ;;  %v932_v53 = vmul.f32 1.442695, %v840_v41 }
 0x38b   : > { %1046 = vmatprep.subr.bf16.mxu0 %v1015_v62  ;;  %1185 = vmatprep.subr.bf16.mxu1 %v1015_v62  ;;  %v1014_v7 = vpack.c.bf16 %v1491_v39, %v1493_v59 }
 0x38c   : > { %v936_v10 = vmul.f32 1.442695, %v842_v21  ;;  %v938_v11 = vmul.f32 1.442695, %v843_v23  ;;  %1502 = vpow2.f32 %v934_v43 }
 0x38e   : > { %1504 = vpow2.f32 %v938_v11  ;;  %v1495_v5 = vpop.eup %1494 }
 0x38f   : > { %1047 = vmatpush1.bf16.xpose.msra.mxu0 %v1014_v7  ;;  %1186 = vmatpush1.bf16.xpose.msra.mxu1 %v1014_v7  ;;  %v766_v25 = vpop.xlane.xlu0 %765  ;;  %1506 = vpow2.f32 %v936_v10 }
 0x390   : > { %v845_v22 = vsub.f32 %v2063_v42, %v766_v25  ;;  %v1497_v28 = vpop.eup %1496  ;;  %v844_v32 = vsub.f32 %v2060_v38, %v766_v25  ;;  %1508 = vpow2.f32 %v932_v53 }
 0x391   : > { %v769_v0 = vpop.xlane.xlu1 %768  ;;  %v1499_v9 = vpop.eup %1498  ;;  %v1017_v27 = vpack.c.bf16 %v1497_v28, %v1495_v5 }
 0x392   : > { %v942_v49 = vmul.f32 1.442695, %v845_v22  ;;  %v846_v54 = vsub.f32 %v2066_v45, %v769_v0  ;;  %v847_v29 = vsub.f32 %v2069_v48, %v769_v0  ;;  %v1501_v12 = vpop.eup %1500  ;;  %v940_v57 = vmul.f32 1.442695, %v844_v32 }
 0x393   : > { %1048 = vmatprep.subr.bf16.mxu0 %v1017_v27  ;;  %1187 = vmatprep.subr.bf16.mxu1 %v1017_v27  ;;  %v1016_v31 = vpack.c.bf16 %v1499_v9, %v1501_v12  ;;  %v2405_v12 = vld [vmem:[#allocation14_spill] sm:$0xff] }
 0x394   : > { %v944_v47 = vmul.f32 1.442695, %v846_v54  ;;  %v946_v51 = vmul.f32 1.442695, %v847_v29  ;;  %1510 = vpow2.f32 %v942_v49 }
 0x396   : > { %1512 = vpow2.f32 %v946_v51  ;;  %v1503_v42 = vpop.eup %1502 }
 0x397   : > { %1049 = vmatpush1.bf16.xpose.msra.mxu0 %v1016_v31  ;;  %1188 = vmatpush1.bf16.xpose.msra.mxu1 %v1016_v31  ;;  %v772_v38 = vpop.xlane.xlu0 %771  ;;  %1514 = vpow2.f32 %v944_v47 }
 0x398   : > { %v849_v33 = vsub.f32 %v2079_v2, %v772_v38  ;;  %v1505_v45 = vpop.eup %1504  ;;  %1516 = vpow2.f32 %v940_v57  ;;  %v848_v20 = vsub.f32 %v2076_v61, %v772_v38  ;;  %v2406_v57 = vld [vmem:[#allocation16_spill] sm:$0xff]  ;;  %v2407_v38 = vld [vmem:[#allocation17_spill] sm:$0xff] }
 0x399   : > { %v775_v48 = vpop.xlane.xlu1 %774  ;;  %v1507_v14 = vpop.eup %1506  ;;  %v1019_v58 = vpack.c.bf16 %v1505_v45, %v1503_v42 }
 0x39a   : > { %v950_v36 = vmul.f32 1.442695, %v849_v33  ;;  %v850_v44 = vsub.f32 %v2082_v13, %v775_v48  ;;  %v851_v56 = vsub.f32 %v2085_v18, %v775_v48  ;;  %v1509_v50 = vpop.eup %1508  ;;  %v948_v4 = vmul.f32 1.442695, %v848_v20 }
 0x39b   : > { %1050 = vmatprep.subr.bf16.mxu0 %v1019_v58  ;;  %1189 = vmatprep.subr.bf16.mxu1 %v1019_v58  ;;  %v1018_v6 = vpack.c.bf16 %v1507_v14, %v1509_v50  ;;  %v2408_v58 = vld [vmem:[#allocation19_spill] sm:$0xff] }
 0x39c   : > { %v952_v19 = vmul.f32 1.442695, %v850_v44  ;;  %v954_v17 = vmul.f32 1.442695, %v851_v56  ;;  %1518 = vpow2.f32 %v950_v36 }
 0x39e   : > { %1520 = vpow2.f32 %v954_v17  ;;  %v1511_v1 = vpop.eup %1510 }
 0x39f   : > { %1051 = vmatpush1.bf16.xpose.msra.mxu0 %v1018_v6  ;;  %1190 = vmatpush1.bf16.xpose.msra.mxu1 %v1018_v6  ;;  %v778_v2 = vpop.xlane.xlu0 %777  ;;  %1522 = vpow2.f32 %v952_v19 }
 0x3a0   : > { %v853_v61 = vsub.f32 %v2095_v35, %v778_v2  ;;  %v1513_v13 = vpop.eup %1512  ;;  %v852_v18 = vsub.f32 %v2092_v30, %v778_v2  ;;  %1524 = vpow2.f32 %v948_v4  ;;  %v2409_v4 = vld [vmem:[#allocation18_spill] sm:$0xff] }
 0x3a1   : > { %v781_v60 = vpop.xlane.xlu1 %780  ;;  %v1515_v37 = vpop.eup %1514  ;;  %v1021_v43 = vpack.c.bf16 %v1513_v13, %v1511_v1 }
 0x3a2   : > { %v958_v8 = vmul.f32 1.442695, %v853_v61  ;;  %v854_v15 = vsub.f32 %v2098_v40, %v781_v60  ;;  %v855_v39 = vsub.f32 %v2101_v46, %v781_v60  ;;  %v1517_v41 = vpop.eup %1516  ;;  %v956_v62 = vmul.f32 1.442695, %v852_v18  ;;  %v2410_v61 = vld [vmem:[#allocation20_spill] sm:$0xff]  ;;  %v2411_v18 = vld [vmem:[#allocation21_spill] sm:$0xff] }
 0x3a3   : > { %1052 = vmatprep.subr.bf16.mxu0 %v1021_v43  ;;  %1191 = vmatprep.subr.bf16.mxu1 %v1021_v43  ;;  %v1020_v59 = vpack.c.bf16 %v1515_v37, %v1517_v41 }
 0x3a4   : > { %v960_v21 = vmul.f32 1.442695, %v854_v15  ;;  %v962_v23 = vmul.f32 1.442695, %v855_v39  ;;  %1526 = vpow2.f32 %v958_v8 }
 0x3a6   : > { %1528 = vpow2.f32 %v962_v23  ;;  %v1519_v35 = vpop.eup %1518 }
 0x3a7   : > { %1053 = vmatpush1.bf16.xpose.msra.mxu0 %v1020_v59  ;;  %1192 = vmatpush1.bf16.xpose.msra.mxu1 %v1020_v59  ;;  %v784_v30 = vpop.xlane.xlu0 %783  ;;  %1530 = vpow2.f32 %v960_v21 }
 0x3a8   : > { %v857_v10 = vsub.f32 %v2111_v16, %v784_v30  ;;  %v1521_v40 = vpop.eup %1520  ;;  %1532 = vpow2.f32 %v956_v62  ;;  %v856_v7 = vsub.f32 %v2108_v63, %v784_v30  ;;  %v2404_v63 = vld [vmem:[#allocation15_spill] sm:$0xff] }
 0x3a9   : > { %v787_v46 = vpop.xlane.xlu1 %786  ;;  %v1523_v11 = vpop.eup %1522  ;;  %v1023_v22 = vpack.c.bf16 %v1521_v40, %v1519_v35  ;;  %v2412_v62 = vld [vmem:[#allocation23_spill] sm:$0xff]  ;;  %v2413_v35 = vld [vmem:[#allocation22_spill] sm:$0xff] }
 0x3aa   : > { %v966_v53 = vmul.f32 1.442695, %v857_v10  ;;  %v858_v25 = vsub.f32 %v2114_v24, %v787_v46  ;;  %v859_v5 = vsub.f32 %v2117_v34, %v787_v46  ;;  %v1525_v28 = vpop.eup %1524  ;;  %v964_v49 = vmul.f32 1.442695, %v856_v7  ;;  %v2414_v7 = vld [vmem:[#allocation24_spill] sm:$0xff] }
 0x3ab   : > { %1054 = vmatprep.subr.bf16.mxu0 %v1023_v22  ;;  %1193 = vmatprep.subr.bf16.mxu1 %v1023_v22  ;;  %v1022_v9 = vpack.c.bf16 %v1523_v11, %v1525_v28 }
 0x3ac   : > { %v968_v32 = vmul.f32 1.442695, %v858_v25  ;;  %v970_v0 = vmul.f32 1.442695, %v859_v5  ;;  %1534 = vpow2.f32 %v966_v53  ;;  %v2415_v25 = vld [vmem:[#allocation25_spill] sm:$0xff] }
 0x3ae   : > { %1536 = vpow2.f32 %v970_v0  ;;  %v1527_v54 = vpop.eup %1526 }
 0x3af   : > { %1055 = vmatpush1.bf16.xpose.msra.mxu0 %v1022_v9  ;;  %1194 = vmatpush1.bf16.xpose.msra.mxu1 %v1022_v9  ;;  %v790_v16 = vpop.xlane.xlu0 %789  ;;  %1538 = vpow2.f32 %v968_v32 }
 0x3b0   : > { %v861_v29 = vsub.f32 %v2404_v63, %v790_v16  ;;  %v1529_v24 = vpop.eup %1528  ;;  %v860_v34 = vsub.f32 %v2405_v12, %v790_v16  ;;  %1540 = vpow2.f32 %v964_v49 }
 0x3b1   : > { %v793_v27 = vpop.xlane.xlu1 %792  ;;  %v1531_v47 = vpop.eup %1530  ;;  %v1025_v45 = vpack.c.bf16 %v1529_v24, %v1527_v54 }
 0x3b2   : > { %v974_v51 = vmul.f32 1.442695, %v861_v29  ;;  %v862_v31 = vsub.f32 %v2406_v57, %v793_v27  ;;  %v863_v42 = vsub.f32 %v2407_v38, %v793_v27  ;;  %v1533_v33 = vpop.eup %1532  ;;  %v972_v20 = vmul.f32 1.442695, %v860_v34 }
 0x3b3   : > { %1056 = vmatprep.subr.bf16.mxu0 %v1025_v45  ;;  %1195 = vmatprep.subr.bf16.mxu1 %v1025_v45  ;;  %v1024_v36 = vpack.c.bf16 %v1531_v47, %v1533_v33 }
 0x3b4   : > { %v976_v48 = vmul.f32 1.442695, %v862_v31  ;;  %v978_v14 = vmul.f32 1.442695, %v863_v42  ;;  %1542 = vpow2.f32 %v974_v51  ;;  %v2416_v51 = vld [vmem:[#allocation26_spill] sm:$0xff] }
 0x3b6   : > { %1544 = vpow2.f32 %v978_v14  ;;  %v1535_v56 = vpop.eup %1534 }
 0x3b7   : > { %1057 = vmatpush1.bf16.xpose.msra.mxu0 %v1024_v36  ;;  %1196 = vmatpush1.bf16.xpose.msra.mxu1 %v1024_v36  ;;  %v796_v44 = vpop.xlane.xlu0 %795  ;;  %1546 = vpow2.f32 %v976_v48 }
 0x3b8   : > { %v865_v50 = vsub.f32 %v2408_v58, %v796_v44  ;;  %v1537_v19 = vpop.eup %1536  ;;  %1548 = vpow2.f32 %v972_v20  ;;  %v864_v2 = vsub.f32 %v2409_v4, %v796_v44  ;;  %v2418_v4 = vld [vmem:[#allocation10_spill] sm:$0xff] }
 0x3b9   : > { %v799_v17 = vpop.xlane.xlu1 %798  ;;  %v1539_v6 = vpop.eup %1538  ;;  %v1027_v37 = vpack.c.bf16 %v1537_v19, %v1535_v56 }
 0x3ba   : > { %v982_v1 = vmul.f32 1.442695, %v865_v50  ;;  %v866_v13 = vsub.f32 %v2410_v61, %v799_v17  ;;  %v867_v60 = vsub.f32 %v2411_v18, %v799_v17  ;;  %v1541_v8 = vpop.eup %1540  ;;  %v980_v43 = vmul.f32 1.442695, %v864_v2  ;;  %v1444_v61 = vld [vmem:[%s2355_s3] sm:$0xff]  }
 0x3bb   : > { %1058 = vmatprep.subr.bf16.mxu0 %v1027_v37  ;;  %1197 = vmatprep.subr.bf16.mxu1 %v1027_v37  ;;  %v1026_v41 = vpack.c.bf16 %v1539_v6, %v1541_v8  ;;  %v2417_v6 = vld [vmem:[#allocation9_spill] sm:$0xff]  ;;  %v2419_v2 = vmov 0  }
 0x3bc   : > { %v984_v15 = vmul.f32 1.442695, %v866_v13  ;;  %v986_v39 = vmul.f32 1.442695, %v867_v60  ;;  %1550 = vpow2.f32 %v982_v1  ;;  %v2420_v1 = vld [vmem:[#allocation11_spill] sm:$0xff]  ;;  %v2421_v13 = vld [vmem:[#allocation12_spill] sm:$0xff] }
 0x3be   : > { %1552 = vpow2.f32 %v986_v39  ;;  %v1543_v23 = vpop.eup %1542 }
 0x3bf   : > { %1059 = vmatpush1.bf16.xpose.msra.mxu0 %v1026_v41  ;;  %1198 = vmatpush1.bf16.xpose.msra.mxu1 %v1026_v41  ;;  %v802_v21 = vpop.xlane.xlu0 %801  ;;  %1554 = vpow2.f32 %v984_v15 }
 0x3c0   : > { %v869_v59 = vsub.f32 %v2412_v62, %v802_v21  ;;  %v1545_v30 = vpop.eup %1544  ;;  %v868_v10 = vsub.f32 %v2413_v35, %v802_v21  ;;  %1556 = vpow2.f32 %v980_v43 }
 0x3c1   : > { %v805_v40 = vpop.xlane.xlu1 %804  ;;  %v1547_v46 = vpop.eup %1546  ;;  %v1029_v28 = vpack.c.bf16 %v1545_v30, %v1543_v23 }
 0x3c2   : > { %v990_v11 = vmul.f32 1.442695, %v869_v59  ;;  %v870_v53 = vsub.f32 %v2414_v7, %v805_v40  ;;  %v871_v5 = vsub.f32 %v2415_v25, %v805_v40  ;;  %v1549_v22 = vpop.eup %1548  ;;  %v988_v9 = vmul.f32 1.442695, %v868_v10 }
 0x3c3   : > { %1060 = vmatprep.subr.bf16.mxu0 %v1029_v28  ;;  %1199 = vmatprep.subr.bf16.mxu1 %v1029_v28  ;;  %v1028_v49 = vpack.c.bf16 %v1547_v46, %v1549_v22 }
 0x3c4   : > { %v992_v32 = vmul.f32 1.442695, %v870_v53  ;;  %v994_v0 = vmul.f32 1.442695, %v871_v5  ;;  %1558 = vpow2.f32 %v990_v11 }
 0x3c6   : > { %1560 = vpow2.f32 %v994_v0  ;;  %v1551_v54 = vpop.eup %1550 }
 0x3c7   : > { %1061 = vmatpush1.bf16.xpose.msra.mxu0 %v1028_v49  ;;  %1200 = vmatpush1.bf16.xpose.msra.mxu1 %v1028_v49  ;;  %v808_v16 = vpop.xlane.xlu0 %807  ;;  %1562 = vpow2.f32 %v992_v32 }
 0x3c8   : > { %v873_v63 = vsub.f32 %v2175_v26, %v808_v16  ;;  %v1553_v29 = vpop.eup %1552  ;;  %1564 = vpow2.f32 %v988_v9  ;;  %v872_v34 = vsub.f32 %v2172_v52, %v808_v16 }
 0x3c9   : > { %v811_v24 = vpop.xlane.xlu1 %810  ;;  %v1555_v12 = vpop.eup %1554  ;;  %v1031_v31 = vpack.c.bf16 %v1553_v29, %v1551_v54  ;;  %v1079_v54 = vstv %s273_s13 }
 0x3ca   : > { %v998_v27 = vmul.f32 1.442695, %v873_v63  ;;  %v874_v47 = vsub.f32 %v2178_v55, %v811_v24  ;;  %v875_v57 = vsub.f32 %v2416_v51, %v811_v24  ;;  %v1557_v38 = vpop.eup %1556  ;;  %v996_v48 = vmul.f32 1.442695, %v872_v34 }
 0x3cb   : > { %1062 = vmatprep.subr.bf16.mxu0 %v1031_v31  ;;  %1201 = vmatprep.subr.bf16.mxu1 %v1031_v31  ;;  %v1030_v45 = vpack.c.bf16 %v1555_v12, %v1557_v38  ;;  %v2422_v12 = vld [vmem:[#allocation13_spill] sm:$0xff] }
 0x3cc   : > { %v1000_v42 = vmul.f32 1.442695, %v874_v47  ;;  %v1002_v33 = vmul.f32 1.442695, %v875_v57  ;;  %1566 = vpow2.f32 %v998_v27 }
 0x3ce   : > { %1568 = vpow2.f32 %v1002_v33  ;;  %v1559_v26 = vpop.eup %1558 }
 0x3cf   : > { %1063 = vmatpush1.bf16.xpose.msra.mxu0 %v1030_v45  ;;  %1202 = vmatpush1.bf16.xpose.msra.mxu1 %v1030_v45  ;;  %1570 = vpow2.f32 %v1000_v42  ;;  %v1578_v42 = vld [vmem:[%s1840_s8] sm:$0xff] }
 0x3d0   : > { %v1561_v52 = vpop.eup %1560  ;;  %1572 = vpow2.f32 %v996_v48 }
 0x3d1   : > { %v1563_v14 = vpop.eup %1562  ;;  %v1033_v55 = vpack.c.bf16 %v1561_v52, %v1559_v26  ;;  %v1579_v26 = vld [vmem:[%s1840_s8 + $0x8] sm:$0xff] }
 0x3d2   : > { %v1565_v20 = vpop.eup %1564 }
 0x3d3   : > { %1064 = vmatprep.subr.bf16.mxu0 %v1033_v55  ;;  %1203 = vmatprep.subr.bf16.mxu1 %v1033_v55  ;;  %v1032_v36 = vpack.c.bf16 %v1563_v14, %v1565_v20  ;;  %v1580_v55 = vld [vmem:[%s1840_s8 + $0x10] sm:$0xff] }
 0x3d6   : > { %v1567_v44 = vpop.eup %1566 }
 0x3d7   : > { %1065 = vmatpush1.bf16.xpose.msra.mxu0 %v1032_v36  ;;  %1204 = vmatpush1.bf16.xpose.msra.mxu1 %v1032_v36  ;;  %v1581_v36 = vld [vmem:[%s1840_s8 + $0x18] sm:$0xff] }
 0x3d8   : > { %v1569_v56 = vpop.eup %1568 }
 0x3d9   : > { %v1571_v58 = vpop.eup %1570  ;;  %v1035_v50 = vpack.c.bf16 %v1569_v56, %v1567_v44 }
 0x3da   : > { %v1573_v19 = vpop.eup %1572 }
 0x3db   : > { %1066 = vmatprep.subr.bf16.mxu0 %v1035_v50  ;;  %1205 = vmatprep.subr.bf16.mxu1 %v1035_v50  ;;  %v1034_v17 = vpack.c.bf16 %v1571_v58, %v1573_v19 }
 0x3df   : > { %1067 = vmatpush1.bf16.xpose.msra.mxu0 %v1034_v17  ;;  %1206 = vmatpush1.bf16.xpose.msra.mxu1 %v1034_v17 }
 0x3e0   : > { %1118 = vmatprep.subr.bf16.mxu0 %v2417_v6  ;;  %v1582_v6 = vld [vmem:[%s1840_s8 + $0x20] sm:$0xff] }
 0x3e6   : > { %1069 = vmatmul.mubr.bf16.vlgmr.msra.gmra.mrb[8].mxu0 %v1688_v3  ;;  %v1445_v3 = vld [vmem:[%s2355_s3 + $0x8] sm:$0xff]  }
 0x3e7   : > { %1119 = vmatpush1.bf16.msra.mxu0 %v2418_v4  ;;  %1150 = vmatprep.mubr.bf16.mxu0 %v2419_v2 }
 0x3e8   : > { %1120 = vmatprep.subr.bf16.mxu0 %v2420_v1 }
 0x3eb   : > { %1121 = vmatpush1.bf16.msra.mxu0 %v2421_v13 }
 0x3ee   : > { %1379 = vmatmul.mubr.msk.bf16.vlgmr.msra.gmra.mrb[12].mxu0 %vm327_vm0, %v1444_v61  ;;  %v1583_v61 = vld [vmem:[%s1840_s8 + $0x28] sm:$0xff] }
 0x3ef   : > { %1160 = vmatprep.mubr.bf16.mxu0 %v2419_v2 }
 0x3f0   : > { %v1090_v15 = vpop.permute.xlu1 %1089  ;;  %v1085_v41 = vpop.permute.xlu0 %1084 }
 0x3f4   : > { %v1095_v30 = vpop.permute.xlu1 %1094 }
 0x3f6   : > { %1380 = vmatmul.mubr.msk.bf16.gmra.mrb[16].mxu0 %vm327_vm0, %v1445_v3 }
 0x3f8   : > { %v1100_v53 = vpop.permute.xlu1 %1099 }
 0x4b9   : > { %v1070_v18 = vpop.f32.mrb[8].mxu0 }
 0x4ba   : > { %v1072_v60 = vpop.f32.mrb[9].mxu0  ;;  %1574 = vrcp.f32 %v1070_v18  ;;  %v1584_v18 = vld [vmem:[%s1840_s8 + $0x30] sm:$0xff] }
 0x4bb   : > { %v1074_v37 = vpop.f32.mrb[10].mxu0  ;;  %1576 = vrcp.f32 %v1072_v60 }
 0x4bc   : > { %v1075_v8 = vpop.f32.mrb[11].mxu0  ;;  %v1585_v37 = vld [vmem:[%s1840_s8 + $0x38] sm:$0xff] }
 0x4c1   : > { %v1152_v39 = vpop.f32.mrb[12].mxu0 }
 0x4c2   : > { %v1154_v43 = vpop.f32.mrb[13].mxu0  ;;  %v1153_v23 = vadd.f32 %v1152_v39, %v1085_v41 }
 0x4c3   : > { %v1156_v21 = vpop.f32.mrb[14].mxu0  ;;  %v1155_v35 = vadd.f32 %v1154_v43, %v1085_v41 }
 0x4c4   : > { %v1157_v62 = vadd.f32 %v1156_v21, %v1090_v15  ;;  %v1158_v59 = vpop.f32.mrb[15].mxu0  ;;  %v1575_v16 = vpop.eup %1574 }
 0x4c5   : > { %v1159_v10 = vadd.f32 %v1158_v59, %v1090_v15  ;;  %v1577_v63 = vpop.eup %1576  ;;  %v1080_v29 = vmul.f32 %v1575_v16, %v1079_v54 }
 0x4c6   : > { %v1171_v40 = vpack.c.bf16 %v1157_v62, %v1153_v23  ;;  %v1081_v24 = vmul.f32 %v1577_v63, %v1079_v54 }
 0x4c7   : > { %v1172_v46 = vpack.c.bf16 %v1159_v10, %v1155_v35  ;;  %v1231_v34 = vrot.slane %v1080_v29, %v2422_v12 }
 0x4c8   : > { %v1235_v47 = vrot.slane %v1081_v24, %v2422_v12 }
 0x4c9   : > { %v1162_v11 = vpop.f32.mrb[16].mxu0  ;;  %1207 = vmatprep.mubr.bf16.mxu1 %v1172_v46 }
 0x4ca   : > { %v1164_v7 = vpop.f32.mrb[17].mxu0  ;;  %1208 = vmatmul.mubr.bf16.vlgmr.msra.gmra.mrb[68].mxu1 %v1171_v40  ;;  %v1163_v5 = vadd.f32 %v1162_v11, %v1095_v30 }
 0x4cb   : > { %v1166_v25 = vpop.f32.mrb[18].mxu0  ;;  %v1165_v32 = vadd.f32 %v1164_v7, %v1095_v30 }
 0x4cc   : > { %v1167_v22 = vadd.f32 %v1166_v25, %v1100_v53  ;;  %v1168_v28 = vpop.f32.mrb[19].mxu0 }
 0x4cd   : > { %v1169_v0 = vadd.f32 %v1168_v28, %v1100_v53 }
 0x4ce   : > { %v1173_v9 = vpack.c.bf16 %v1167_v22, %v1163_v5 }
 0x4cf   : > { %v1174_v49 = vpack.c.bf16 %v1169_v0, %v1165_v32 }
 0x4d1   : > { %1217 = vmatprep.mubr.bf16.mxu1 %v1174_v49 }
 0x4d2   : > { %1218 = vmatmul.mubr.bf16.gmra.mrb[72].mxu1 %v1173_v9 }
 0x59d   : > { %v1209_v27 = vpop.f32.mrb[68].mxu1 }
 0x59e   : > { %v1236_v51 = vmul.f32 %v1231_v34, %v1209_v27  ;;  %v1211_v57 = vpop.f32.mrb[69].mxu1 }
 0x59f   : > { %v1237_v31 = vmul.f32 %v1235_v47, %v1211_v57  ;;  %v1213_v38 = vpop.f32.mrb[70].mxu1 }
 0x5a0   : > { %v1244_v33 = vadd.f32 %v1578_v42, %v1236_v51  ;;  %v1238_v45 = vmul.f32 %v1231_v34, %v1213_v38  ;;  %v1215_v48 = vpop.f32.mrb[71].mxu1 }
 0x5a1   : > { %v1245_v52 = vadd.f32 %v1579_v26, %v1237_v31  ;;  %v1239_v14 = vmul.f32 %v1235_v47, %v1215_v48 }
 0x5a2   : > { %1252 = vst [vmem:[%s2285_s12] sm:$0xff] %v1244_v33  ;;  %v1246_v20 = vadd.f32 %v1580_v55, %v1238_v45 }
 0x5a3   : > { %1253 = vst [vmem:[%s2285_s12 + $0x8] sm:$0xff] %v1245_v52  ;;  %v1247_v44 = vadd.f32 %v1581_v36, %v1239_v14 }
 0x5a4   : > { %1254 = vst [vmem:[%s2285_s12 + $0x10] sm:$0xff] %v1246_v20 }
 0x5a5   : > { %1255 = vst [vmem:[%s2285_s12 + $0x18] sm:$0xff] %v1247_v44  ;;  %v1219_v56 = vpop.f32.mrb[72].mxu1 }
 0x5a6   : > { %v1240_v58 = vmul.f32 %v1231_v34, %v1219_v56  ;;  %v1221_v50 = vpop.f32.mrb[73].mxu1 }
 0x5a7   : > { %v1241_v19 = vmul.f32 %v1235_v47, %v1221_v50  ;;  %v1223_v17 = vpop.f32.mrb[74].mxu1 }
 0x5a8   : > { %v1248_v4 = vadd.f32 %v1582_v6, %v1240_v58  ;;  %v1242_v2 = vmul.f32 %v1231_v34, %v1223_v17  ;;  %v1225_v1 = vpop.f32.mrb[75].mxu1 }
 0x5a9   : > { %v1249_v13 = vadd.f32 %v1583_v61, %v1241_v19  ;;  %v1243_v3 = vmul.f32 %v1235_v47, %v1225_v1 }
 0x5aa   : > { %1256 = vst [vmem:[%s2285_s12 + $0x20] sm:$0xff] %v1248_v4  ;;  %v1250_v60 = vadd.f32 %v1584_v18, %v1242_v2 }
 0x5ab   : > { %1257 = vst [vmem:[%s2285_s12 + $0x28] sm:$0xff] %v1249_v13  ;;  %v1251_v8 = vadd.f32 %v1585_v37, %v1243_v3 }
 0x5ac   : > { %1258 = vst [vmem:[%s2285_s12 + $0x30] sm:$0xff] %v1250_v60 }
 0x5ad   : > { %1259 = vst [vmem:[%s2285_s12 + $0x38] sm:$0xff] %v1251_v8 }
 0x5ae   : > { %1629 = shalt.err (!%p1626_p2)
}
 0x5af   : > { %s1630_s8 = scalar_lea.hbm %s2304_s16, 1024  ;;  %s1634_s21 = scalar_lea.hbm %s2358_s6, 2048 }
 0x5b0   : > { %p1631_p4 = scmp.ne.s32.totalorder %s2304_s16, %s1630_s8  ;;  %p1635_p9 = scmp.lt.u32.totalorder %s2304_s16, %s2358_s6 }
 0x5b1   : > { %p1636_p1 = scmp.lt.u32.totalorder %s1634_s21, %s1630_s8  ;;  %p1638_p6 = scmp.lt.u32.totalorder %s1630_s8, %s2304_s16 }
 0x5b2   : > { %p1632_p5 = pnand %p1631_p4, %p2423_p11 }
 0x5b3   : > { %p1637_p3 = por %p1636_p1, %p1635_p9 }
 0x5b4   : > { %p1633_p7 = pneg %p1632_p5 }
 0x5b5   : > { %p1639_p12 = por %p1638_p6, %p1637_p3 }
 0x5b7   : > { %p1640_p13 = pnand %p1639_p12, %p1633_p7 }
 0x5b9   : > { %1643 = shalt.err (!%p1640_p13)
}
 0x5ba   : > { %s1690_s14 = smov 256   ;;  %s1691_s15 = smov 16  }
 0x5bb   : > { %1390 = dma.vmem_to_hbm [thread:$0]  (%p2423_p11), %s2296_s29, 1024, %s2304_s16, %s1261_s18, %s1690_s14, %s1690_s14, %s1691_s15  }
 0x5bc PF: > { %s1289_s5 = sand.u32 1, %s1670_s23   ;;  %p2424_p8 = scmp.ne.s32.totalorder %s2384_s11, 0 }
 0x5bd   : > { %p2425_p10 = scmp.ge.s32.totalorder %s1682_s26, 2  ;;  %s1290_s22 = scalar_lea.sflag [#allocation5], %s1289_s5 }
 0x5bf   : > { %p1397_p0 = pnand %p2425_p10, %p2424_p8 }
 0x5c1   : > { %1665 = dma.done.wait (!%p1397_p0), %s1290_s22, 1024  }
 0x5c2   : > { %1667 = vsyncadd (!%p1397_p0), %s1290_s22, 4294966272  ;;  %p20_p2 = scmp.ge.s32.totalorder %s1755_s28, 4   ;;  %s2426_s23 = smov %s1674_s24 }
 0x5c3   : > { %s2427_s24 = smov %s1678_s25  ;;  %s2428_s25 = smov %s1767_s7 }
 0x5c4   : > { %s2429_s26 = smov %s1755_s28  ;;  %22 = sbr.rel (!%p20_p2) target bundleno = 7 (0x7), region = 89 }
 0x5cb   :  { %1295 = vsyncpa [#allocation4], 1 }
 0x5cc   :  { %1297 = vsyncpa [#allocation4 + $0x1], 1 }
 0x5cd   :  { %1298 = vsyncpa [#allocation5], 1 }
 0x5ce   :  { %1300 = vsyncpa [#allocation5 + $0x1], 1 }

</bundles_post_ra>
